<compile_context>
chip_gen: v6e
topology: v6e:2x2x1
jax: 0.10.0
libtpu: 0.0.40
codegen_flags: <defaults>
</compile_context>

<pallas_src>
import functools

import jax
import jax.numpy as jnp
from jax import lax
from jax.experimental import pallas as pl
from jax.experimental.pallas import tpu as pltpu


_UNROLL_SEQ_MAX = 16  # full Python unroll up to this seq_len; fori_loop after.


def _rnn_kernel(num_layers, unrolled, *refs):
    # Positional ref layout (whhT only when num_layers > 1; hs scratch only on
    # the fori_loop path).
    it = iter(refs)
    x_ref = next(it)                                    # (S, Ip)
    whT_ref = next(it)                                  # (L, Hp, Hp)
    whhT_ref = next(it) if num_layers > 1 else None     # (L-1, Hp, Hp)
    wxT_ref = next(it)                                  # (Ip, Hp)
    wyT_ref = next(it)                                  # (Hp, Ip)
    bh_ref = next(it)                                   # (L, Hp)
    by_ref = next(it)                                   # (1, Ip)
    out_ref = next(it)                                  # (S, Ip)
    hout_ref = next(it)                                 # (L, Hp)
    xh_ref = next(it)                                   # scratch (S, Hp)
    hs_ref = None if unrolled else next(it)             # scratch (S, Hp)

    seq_len = x_ref.shape[0]
    hp = whT_ref.shape[-1]

    # ---- hoisted input projection (one well-shaped matmul); B_h[0] folded in.
    xh_ref[...] = (
        jnp.dot(x_ref[...], wxT_ref[...], preferred_element_type=jnp.float32)
        + bh_ref[pl.ds(0, 1), :])

    def step(i, carry):
        # carry: tuple of num_layers rows, each (1, hp), from timestep i-1.
        # Layer 0: everything except the self-recurrent dot is in xh already.
        h0 = jnp.tanh(
            jnp.dot(carry[0], whT_ref[0], preferred_element_type=jnp.float32)
            + xh_ref[pl.ds(i, 1), :])
        new_rows = [h0]
        for l in range(1, num_layers):
            # OFF-chain: depends only on the previous timestep's carry -> can
            # issue early, hidden under the layer-(l-1) chain.  Bias folded in.
            off = (jnp.dot(carry[l], whT_ref[l],
                           preferred_element_type=jnp.float32)
                   + bh_ref[pl.ds(l, 1), :])
            # ON-chain: only the freshest-data mat-vec gates the next tanh.
            on = jnp.dot(new_rows[l - 1], whhT_ref[l - 1],
                         preferred_element_type=jnp.float32)
            new_rows.append(jnp.tanh(off + on))
        return tuple(new_rows)

    init = tuple(jnp.zeros((1, hp), jnp.float32) for _ in range(num_layers))

    if unrolled:
        carry = init
        last_rows = []
        for i in range(seq_len):
            carry = step(i, carry)
            last_rows.append(carry[-1])
        h_final = carry
        # Assemble the last-layer states once (no per-step scratch round-trip).
        hs = jnp.concatenate(last_rows, axis=0)          # (S, Hp)
    else:
        def body(i, carry):
            new = step(i, carry)
            hs_ref[pl.ds(i, 1), :] = new[-1]
            return new
        h_final = lax.fori_loop(0, seq_len, body, init, unroll=4)
        hs = hs_ref[...]

    # ---- hoisted output projection: one matmul + one lane-dense store.
    out_ref[...] = (
        jnp.dot(hs, wyT_ref[...], preferred_element_type=jnp.float32)
        + by_ref[...])

    # Final hidden state, one dense store.
    hout_ref[...] = jnp.concatenate(h_final, axis=0)


def _round_up(n, m):
    return ((n + m - 1) // m) * m


def _pad2(a, rows, cols):
    r, c = a.shape
    return jnp.pad(a, ((0, rows - r), (0, cols - c)))


def rnn_v2_forward(x, W_h, W_x, W_y, B_h, B_y, W_hh):
    """x: (seq_len, input_size) f32.  Returns (output (seq_len, input_size),
    h (num_layers, hidden_size)) matching the PyTorch module forward()."""
    seq_len, input_size = x.shape
    num_layers, hidden_size, _ = W_h.shape

    # Lane padding to 128 so every vreg / MXU column is dense.
    hp = _round_up(hidden_size, 128)
    ip = _round_up(input_size, 128)

    x_p = _pad2(x, seq_len, ip)                                      # (S, Ip)
    whT = jnp.stack([_pad2(W_h[l].T, hp, hp)
                     for l in range(num_layers)])                    # (L,Hp,Hp)
    wxT = _pad2(W_x.T, ip, hp)                                       # (Ip, Hp)
    wyT = _pad2(W_y.T, hp, ip)                                       # (Hp, Ip)
    bh = _pad2(B_h, num_layers, hp)                                  # (L, Hp)
    by = _pad2(B_y[None, :], 1, ip)                                  # (1, Ip)

    operands = [x_p, whT]
    if num_layers > 1:
        whhT = jnp.stack([_pad2(W_hh[l].T, hp, hp)
                          for l in range(num_layers - 1)])           # (L-1,Hp,Hp)
        operands.append(whhT)
    operands += [wxT, wyT, bh, by]

    unrolled = seq_len <= _UNROLL_SEQ_MAX

    scratch_shapes = [pltpu.VMEM((seq_len, hp), jnp.float32)]        # xh
    if not unrolled:
        scratch_shapes.append(pltpu.VMEM((seq_len, hp), jnp.float32))  # hs

    # VMEM budget: this call is grid-less (nothing double-buffered), so size
    # it as resident operands + outputs + scratch + headroom, capped at 48 MiB
    # so the request is valid on v7x (64 MiB physical) as well as v5e/v6e.
    resident_bytes = sum(int(a.size) * a.dtype.itemsize for a in operands)
    resident_bytes += (seq_len * ip + num_layers * hp) * 4           # outputs
    scratch_bytes = len(scratch_shapes) * seq_len * hp * 4
    vmem_limit = min(
        max(16 << 20, resident_bytes + scratch_bytes + (2 << 20)), 48 << 20)

    vmem = pl.BlockSpec(memory_space=pltpu.MemorySpace.VMEM)

    out_p, h_p = pl.pallas_call(
        functools.partial(_rnn_kernel, num_layers, unrolled),
        out_shape=(
            jax.ShapeDtypeStruct((seq_len, ip), jnp.float32),
            jax.ShapeDtypeStruct((num_layers, hp), jnp.float32),
        ),
        in_specs=[vmem] * len(operands),
        out_specs=(vmem, vmem),
        scratch_shapes=scratch_shapes,
        compiler_params=pltpu.CompilerParams(vmem_limit_bytes=vmem_limit),
    )(*operands)

    return out_p[:, :input_size], h_p[:, :hidden_size]


def rnn_v2_reference(x, W_h, W_x, W_y, B_h, B_y, W_hh):
    """Pure-JAX reference mirroring the PyTorch forward, for validation."""
    hi = lax.Precision.HIGHEST
    seq_len = x.shape[0]
    num_layers, hidden_size, _ = W_h.shape
    h = jnp.zeros((num_layers, hidden_size), jnp.float32)
    outputs = []
    for i in range(seq_len):
        new_rows = []
        for l in range(num_layers):
            acc = jnp.dot(W_h[l], h[l], precision=hi)
            if l == 0:
                acc = acc + jnp.dot(W_x, x[i], precision=hi)
            else:
                acc = acc + jnp.dot(W_hh[l - 1], new_rows[l - 1], precision=hi)
            new_rows.append(jnp.tanh(acc + B_h[l]))
        h = jnp.stack(new_rows)
        outputs.append(jnp.dot(W_y, h[-1], precision=hi) + B_y)
    return jnp.stack(outputs), h


if __name__ == "__main__":
    # Small shapes consistent with the module: seq=8, input=16, hidden=32, L=2
    seq_len, input_size, hidden_size, num_layers = 8, 16, 32, 2

    key = jax.random.PRNGKey(0)
    k_x, k_wh, k_wx, k_wy, k_whh, k_bh, k_by = jax.random.split(key, 7)

    x = jax.random.normal(k_x, (seq_len, input_size), jnp.float32)
    W_h = jax.random.normal(k_wh, (num_layers, hidden_size, hidden_size),
                            jnp.float32)
    W_x = jax.random.normal(k_wx, (hidden_size, input_size), jnp.float32)
    W_y = jax.random.normal(k_wy, (input_size, hidden_size), jnp.float32)
    # Module initializes biases to zero; use small random values here so the
    # bias-handling paths are actually exercised numerically.
    B_h = 0.1 * jax.random.normal(k_bh, (num_layers, hidden_size), jnp.float32)
    B_y = 0.1 * jax.random.normal(k_by, (input_size,), jnp.float32)
    W_hh = (jax.random.normal(k_whh,
                              (num_layers - 1, hidden_size, hidden_size),
                              jnp.float32)
            if num_layers > 1 else None)

    out, h = rnn_v2_forward(x, W_h, W_x, W_y, B_h, B_y, W_hh)
    jax.block_until_ready((out, h))

    out_ref, h_ref = rnn_v2_reference(x, W_h, W_x, W_y, B_h, B_y, W_hh)
    assert out.shape == (seq_len, input_size)
    assert h.shape == (num_layers, hidden_size)
    assert jnp.allclose(out, out_ref, atol=1e-3, rtol=1e-3), \
        float(jnp.abs(out - out_ref).max())
    assert jnp.allclose(h, h_ref, atol=1e-3, rtol=1e-3), \
        float(jnp.abs(h - h_ref).max())

    print("KERNEL_OK")
</pallas_src>

<mosaic_0001>
module attributes {stable_mosaic.version = 11 : i64} {
  func.func @_rnn_kernel(%arg0: memref<8x128xf32, #tpu.memory_space<vmem>>, %arg1: memref<2x128x128xf32, #tpu.memory_space<vmem>>, %arg2: memref<1x128x128xf32, #tpu.memory_space<vmem>>, %arg3: memref<128x128xf32, #tpu.memory_space<vmem>>, %arg4: memref<128x128xf32, #tpu.memory_space<vmem>>, %arg5: memref<2x128xf32, #tpu.memory_space<vmem>>, %arg6: memref<1x128xf32, #tpu.memory_space<vmem>>, %arg7: memref<8x128xf32, #tpu.memory_space<vmem>>, %arg8: memref<2x128xf32, #tpu.memory_space<vmem>>, %arg9: memref<8x128xf32, #tpu.memory_space<vmem>>) attributes {dimension_semantics = [], scalar_prefetch = 0 : i64, scratch_operands = 1 : i64, tpu.core_type = #tpu.core_type<tc>} {
    %c0 = arith.constant 0 : index
    %c0_0 = arith.constant 0 : index
    %0 = vector.load %arg0[%c0, %c0_0] : memref<8x128xf32, #tpu.memory_space<vmem>>, vector<8x128xf32>
    %c0_1 = arith.constant 0 : index
    %c0_2 = arith.constant 0 : index
    %1 = vector.load %arg3[%c0_1, %c0_2] : memref<128x128xf32, #tpu.memory_space<vmem>>, vector<128x128xf32>
    %cst = arith.constant dense<0.000000e+00> : vector<8x128xf32>
    %2 = tpu.matmul %0, %1, %cst {dimension_numbers = #tpu.dot_dimension_numbers<[1], [0], [0], [1], [0, 0, 1, 1], [], []>} : vector<8x128xf32>, vector<128x128xf32>, vector<8x128xf32> -> vector<8x128xf32>
    %c0_3 = arith.constant 0 : index
    %c0_4 = arith.constant 0 : index
    %3 = vector.load %arg5[%c0_3, %c0_4] : memref<2x128xf32, #tpu.memory_space<vmem>>, vector<1x128xf32>
    %4 = vector.broadcast %3 : vector<1x128xf32> to vector<8x128xf32>
    %5 = arith.addf %2, %4 : vector<8x128xf32>
    %c0_5 = arith.constant 0 : index
    %c0_6 = arith.constant 0 : index
    %6 = vector.load %arg9[%c0_5, %c0_6] : memref<8x128xf32, #tpu.memory_space<vmem>>, vector<8x128xf32>
    tpu.vector_store %arg9[%c0_5, %c0_6], %5 {strides = array<i32>} : memref<8x128xf32, #tpu.memory_space<vmem>>, vector<8x128xf32>,
    %cst_7 = arith.constant 0.000000e+00 : f32
    %7 = vector.broadcast %cst_7 : f32 to vector<1x128xf32>
    %cst_8 = arith.constant 0.000000e+00 : f32
    %8 = vector.broadcast %cst_8 : f32 to vector<1x128xf32>
    %c0_9 = arith.constant 0 : index
    %c0_10 = arith.constant 0 : index
    %c0_11 = arith.constant 0 : index
    %9 = vector.load %arg1[%c0_9, %c0_10, %c0_11] : memref<2x128x128xf32, #tpu.memory_space<vmem>>, vector<1x128x128xf32>
    %10 = vector.shape_cast %9 : vector<1x128x128xf32> to vector<128x128xf32>
    %cst_12 = arith.constant dense<0.000000e+00> : vector<1x128xf32>
    %11 = tpu.matmul %7, %10, %cst_12 {dimension_numbers = #tpu.dot_dimension_numbers<[1], [0], [0], [1], [0, 0, 1, 1], [], []>} : vector<1x128xf32>, vector<128x128xf32>, vector<1x128xf32> -> vector<1x128xf32>
    %c0_13 = arith.constant 0 : index
    %c0_14 = arith.constant 0 : index
    %12 = vector.load %arg9[%c0_13, %c0_14] : memref<8x128xf32, #tpu.memory_space<vmem>>, vector<1x128xf32>
    %13 = arith.addf %11, %12 : vector<1x128xf32>
    %14 = math.tanh %13 : vector<1x128xf32>
    %c1 = arith.constant 1 : index
    %c0_15 = arith.constant 0 : index
    %c0_16 = arith.constant 0 : index
    %15 = vector.load %arg1[%c1, %c0_15, %c0_16] : memref<2x128x128xf32, #tpu.memory_space<vmem>>, vector<1x128x128xf32>
    %16 = vector.shape_cast %15 : vector<1x128x128xf32> to vector<128x128xf32>
    %cst_17 = arith.constant dense<0.000000e+00> : vector<1x128xf32>
    %17 = tpu.matmul %8, %16, %cst_17 {dimension_numbers = #tpu.dot_dimension_numbers<[1], [0], [0], [1], [0, 0, 1, 1], [], []>} : vector<1x128xf32>, vector<128x128xf32>, vector<1x128xf32> -> vector<1x128xf32>
    %c1_18 = arith.constant 1 : index
    %c0_19 = arith.constant 0 : index
    %18 = vector.load %arg5[%c1_18, %c0_19] : memref<2x128xf32, #tpu.memory_space<vmem>>, vector<1x128xf32>
    %19 = arith.addf %17, %18 : vector<1x128xf32>
    %c0_20 = arith.constant 0 : index
    %c0_21 = arith.constant 0 : index
    %c0_22 = arith.constant 0 : index
    %20 = vector.load %arg2[%c0_20, %c0_21, %c0_22] : memref<1x128x128xf32, #tpu.memory_space<vmem>>, vector<1x128x128xf32>
    %21 = vector.shape_cast %20 : vector<1x128x128xf32> to vector<128x128xf32>
    %cst_23 = arith.constant dense<0.000000e+00> : vector<1x128xf32>
    %22 = tpu.matmul %14, %21, %cst_23 {dimension_numbers = #tpu.dot_dimension_numbers<[1], [0], [0], [1], [0, 0, 1, 1], [], []>} : vector<1x128xf32>, vector<128x128xf32>, vector<1x128xf32> -> vector<1x128xf32>
    %23 = arith.addf %19, %22 : vector<1x128xf32>
    %24 = math.tanh %23 : vector<1x128xf32>
    %c0_24 = arith.constant 0 : index
    %c0_25 = arith.constant 0 : index
    %c0_26 = arith.constant 0 : index
    %25 = vector.load %arg1[%c0_24, %c0_25, %c0_26] : memref<2x128x128xf32, #tpu.memory_space<vmem>>, vector<1x128x128xf32>
    %26 = vector.shape_cast %25 : vector<1x128x128xf32> to vector<128x128xf32>
    %cst_27 = arith.constant dense<0.000000e+00> : vector<1x128xf32>
    %27 = tpu.matmul %14, %26, %cst_27 {dimension_numbers = #tpu.dot_dimension_numbers<[1], [0], [0], [1], [0, 0, 1, 1], [], []>} : vector<1x128xf32>, vector<128x128xf32>, vector<1x128xf32> -> vector<1x128xf32>
    %c1_28 = arith.constant 1 : index
    %c0_29 = arith.constant 0 : index
    %28 = vector.load %arg9[%c1_28, %c0_29] : memref<8x128xf32, #tpu.memory_space<vmem>>, vector<1x128xf32>
    %29 = arith.addf %27, %28 : vector<1x128xf32>
    %30 = math.tanh %29 : vector<1x128xf32>
    %c1_30 = arith.constant 1 : index
    %c0_31 = arith.constant 0 : index
    %c0_32 = arith.constant 0 : index
    %31 = vector.load %arg1[%c1_30, %c0_31, %c0_32] : memref<2x128x128xf32, #tpu.memory_space<vmem>>, vector<1x128x128xf32>
    %32 = vector.shape_cast %31 : vector<1x128x128xf32> to vector<128x128xf32>
    %cst_33 = arith.constant dense<0.000000e+00> : vector<1x128xf32>
    %33 = tpu.matmul %24, %32, %cst_33 {dimension_numbers = #tpu.dot_dimension_numbers<[1], [0], [0], [1], [0, 0, 1, 1], [], []>} : vector<1x128xf32>, vector<128x128xf32>, vector<1x128xf32> -> vector<1x128xf32>
    %c1_34 = arith.constant 1 : index
    %c0_35 = arith.constant 0 : index
    %34 = vector.load %arg5[%c1_34, %c0_35] : memref<2x128xf32, #tpu.memory_space<vmem>>, vector<1x128xf32>
    %35 = arith.addf %33, %34 : vector<1x128xf32>
    %c0_36 = arith.constant 0 : index
    %c0_37 = arith.constant 0 : index
    %c0_38 = arith.constant 0 : index
    %36 = vector.load %arg2[%c0_36, %c0_37, %c0_38] : memref<1x128x128xf32, #tpu.memory_space<vmem>>, vector<1x128x128xf32>
    %37 = vector.shape_cast %36 : vector<1x128x128xf32> to vector<128x128xf32>
    %cst_39 = arith.constant dense<0.000000e+00> : vector<1x128xf32>
    %38 = tpu.matmul %30, %37, %cst_39 {dimension_numbers = #tpu.dot_dimension_numbers<[1], [0], [0], [1], [0, 0, 1, 1], [], []>} : vector<1x128xf32>, vector<128x128xf32>, vector<1x128xf32> -> vector<1x128xf32>
    %39 = arith.addf %35, %38 : vector<1x128xf32>
    %40 = math.tanh %39 : vector<1x128xf32>
    %c0_40 = arith.constant 0 : index
    %c0_41 = arith.constant 0 : index
    %c0_42 = arith.constant 0 : index
    %41 = vector.load %arg1[%c0_40, %c0_41, %c0_42] : memref<2x128x128xf32, #tpu.memory_space<vmem>>, vector<1x128x128xf32>
    %42 = vector.shape_cast %41 : vector<1x128x128xf32> to vector<128x128xf32>
    %cst_43 = arith.constant dense<0.000000e+00> : vector<1x128xf32>
    %43 = tpu.matmul %30, %42, %cst_43 {dimension_numbers = #tpu.dot_dimension_numbers<[1], [0], [0], [1], [0, 0, 1, 1], [], []>} : vector<1x128xf32>, vector<128x128xf32>, vector<1x128xf32> -> vector<1x128xf32>
    %c2 = arith.constant 2 : index
    %c0_44 = arith.constant 0 : index
    %44 = vector.load %arg9[%c2, %c0_44] : memref<8x128xf32, #tpu.memory_space<vmem>>, vector<1x128xf32>
    %45 = arith.addf %43, %44 : vector<1x128xf32>
    %46 = math.tanh %45 : vector<1x128xf32>
    %c1_45 = arith.constant 1 : index
    %c0_46 = arith.constant 0 : index
    %c0_47 = arith.constant 0 : index
    %47 = vector.load %arg1[%c1_45, %c0_46, %c0_47] : memref<2x128x128xf32, #tpu.memory_space<vmem>>, vector<1x128x128xf32>
    %48 = vector.shape_cast %47 : vector<1x128x128xf32> to vector<128x128xf32>
    %cst_48 = arith.constant dense<0.000000e+00> : vector<1x128xf32>
    %49 = tpu.matmul %40, %48, %cst_48 {dimension_numbers = #tpu.dot_dimension_numbers<[1], [0], [0], [1], [0, 0, 1, 1], [], []>} : vector<1x128xf32>, vector<128x128xf32>, vector<1x128xf32> -> vector<1x128xf32>
    %c1_49 = arith.constant 1 : index
    %c0_50 = arith.constant 0 : index
    %50 = vector.load %arg5[%c1_49, %c0_50] : memref<2x128xf32, #tpu.memory_space<vmem>>, vector<1x128xf32>
    %51 = arith.addf %49, %50 : vector<1x128xf32>
    %c0_51 = arith.constant 0 : index
    %c0_52 = arith.constant 0 : index
    %c0_53 = arith.constant 0 : index
    %52 = vector.load %arg2[%c0_51, %c0_52, %c0_53] : memref<1x128x128xf32, #tpu.memory_space<vmem>>, vector<1x128x128xf32>
    %53 = vector.shape_cast %52 : vector<1x128x128xf32> to vector<128x128xf32>
    %cst_54 = arith.constant dense<0.000000e+00> : vector<1x128xf32>
    %54 = tpu.matmul %46, %53, %cst_54 {dimension_numbers = #tpu.dot_dimension_numbers<[1], [0], [0], [1], [0, 0, 1, 1], [], []>} : vector<1x128xf32>, vector<128x128xf32>, vector<1x128xf32> -> vector<1x128xf32>
    %55 = arith.addf %51, %54 : vector<1x128xf32>
    %56 = math.tanh %55 : vector<1x128xf32>
    %c0_55 = arith.constant 0 : index
    %c0_56 = arith.constant 0 : index
    %c0_57 = arith.constant 0 : index
    %57 = vector.load %arg1[%c0_55, %c0_56, %c0_57] : memref<2x128x128xf32, #tpu.memory_space<vmem>>, vector<1x128x128xf32>
    %58 = vector.shape_cast %57 : vector<1x128x128xf32> to vector<128x128xf32>
    %cst_58 = arith.constant dense<0.000000e+00> : vector<1x128xf32>
    %59 = tpu.matmul %46, %58, %cst_58 {dimension_numbers = #tpu.dot_dimension_numbers<[1], [0], [0], [1], [0, 0, 1, 1], [], []>} : vector<1x128xf32>, vector<128x128xf32>, vector<1x128xf32> -> vector<1x128xf32>
    %c3 = arith.constant 3 : index
    %c0_59 = arith.constant 0 : index
    %60 = vector.load %arg9[%c3, %c0_59] : memref<8x128xf32, #tpu.memory_space<vmem>>, vector<1x128xf32>
    %61 = arith.addf %59, %60 : vector<1x128xf32>
    %62 = math.tanh %61 : vector<1x128xf32>
    %c1_60 = arith.constant 1 : index
    %c0_61 = arith.constant 0 : index
    %c0_62 = arith.constant 0 : index
    %63 = vector.load %arg1[%c1_60, %c0_61, %c0_62] : memref<2x128x128xf32, #tpu.memory_space<vmem>>, vector<1x128x128xf32>
    %64 = vector.shape_cast %63 : vector<1x128x128xf32> to vector<128x128xf32>
    %cst_63 = arith.constant dense<0.000000e+00> : vector<1x128xf32>
    %65 = tpu.matmul %56, %64, %cst_63 {dimension_numbers = #tpu.dot_dimension_numbers<[1], [0], [0], [1], [0, 0, 1, 1], [], []>} : vector<1x128xf32>, vector<128x128xf32>, vector<1x128xf32> -> vector<1x128xf32>
    %c1_64 = arith.constant 1 : index
    %c0_65 = arith.constant 0 : index
    %66 = vector.load %arg5[%c1_64, %c0_65] : memref<2x128xf32, #tpu.memory_space<vmem>>, vector<1x128xf32>
    %67 = arith.addf %65, %66 : vector<1x128xf32>
    %c0_66 = arith.constant 0 : index
    %c0_67 = arith.constant 0 : index
    %c0_68 = arith.constant 0 : index
    %68 = vector.load %arg2[%c0_66, %c0_67, %c0_68] : memref<1x128x128xf32, #tpu.memory_space<vmem>>, vector<1x128x128xf32>
    %69 = vector.shape_cast %68 : vector<1x128x128xf32> to vector<128x128xf32>
    %cst_69 = arith.constant dense<0.000000e+00> : vector<1x128xf32>
    %70 = tpu.matmul %62, %69, %cst_69 {dimension_numbers = #tpu.dot_dimension_numbers<[1], [0], [0], [1], [0, 0, 1, 1], [], []>} : vector<1x128xf32>, vector<128x128xf32>, vector<1x128xf32> -> vector<1x128xf32>
    %71 = arith.addf %67, %70 : vector<1x128xf32>
    %72 = math.tanh %71 : vector<1x128xf32>
    %c0_70 = arith.constant 0 : index
    %c0_71 = arith.constant 0 : index
    %c0_72 = arith.constant 0 : index
    %73 = vector.load %arg1[%c0_70, %c0_71, %c0_72] : memref<2x128x128xf32, #tpu.memory_space<vmem>>, vector<1x128x128xf32>
    %74 = vector.shape_cast %73 : vector<1x128x128xf32> to vector<128x128xf32>
    %cst_73 = arith.constant dense<0.000000e+00> : vector<1x128xf32>
    %75 = tpu.matmul %62, %74, %cst_73 {dimension_numbers = #tpu.dot_dimension_numbers<[1], [0], [0], [1], [0, 0, 1, 1], [], []>} : vector<1x128xf32>, vector<128x128xf32>, vector<1x128xf32> -> vector<1x128xf32>
    %c4 = arith.constant 4 : index
    %c0_74 = arith.constant 0 : index
    %76 = vector.load %arg9[%c4, %c0_74] : memref<8x128xf32, #tpu.memory_space<vmem>>, vector<1x128xf32>
    %77 = arith.addf %75, %76 : vector<1x128xf32>
    %78 = math.tanh %77 : vector<1x128xf32>
    %c1_75 = arith.constant 1 : index
    %c0_76 = arith.constant 0 : index
    %c0_77 = arith.constant 0 : index
    %79 = vector.load %arg1[%c1_75, %c0_76, %c0_77] : memref<2x128x128xf32, #tpu.memory_space<vmem>>, vector<1x128x128xf32>
    %80 = vector.shape_cast %79 : vector<1x128x128xf32> to vector<128x128xf32>
    %cst_78 = arith.constant dense<0.000000e+00> : vector<1x128xf32>
    %81 = tpu.matmul %72, %80, %cst_78 {dimension_numbers = #tpu.dot_dimension_numbers<[1], [0], [0], [1], [0, 0, 1, 1], [], []>} : vector<1x128xf32>, vector<128x128xf32>, vector<1x128xf32> -> vector<1x128xf32>
    %c1_79 = arith.constant 1 : index
    %c0_80 = arith.constant 0 : index
    %82 = vector.load %arg5[%c1_79, %c0_80] : memref<2x128xf32, #tpu.memory_space<vmem>>, vector<1x128xf32>
    %83 = arith.addf %81, %82 : vector<1x128xf32>
    %c0_81 = arith.constant 0 : index
    %c0_82 = arith.constant 0 : index
    %c0_83 = arith.constant 0 : index
    %84 = vector.load %arg2[%c0_81, %c0_82, %c0_83] : memref<1x128x128xf32, #tpu.memory_space<vmem>>, vector<1x128x128xf32>
    %85 = vector.shape_cast %84 : vector<1x128x128xf32> to vector<128x128xf32>
    %cst_84 = arith.constant dense<0.000000e+00> : vector<1x128xf32>
    %86 = tpu.matmul %78, %85, %cst_84 {dimension_numbers = #tpu.dot_dimension_numbers<[1], [0], [0], [1], [0, 0, 1, 1], [], []>} : vector<1x128xf32>, vector<128x128xf32>, vector<1x128xf32> -> vector<1x128xf32>
    %87 = arith.addf %83, %86 : vector<1x128xf32>
    %88 = math.tanh %87 : vector<1x128xf32>
    %c0_85 = arith.constant 0 : index
    %c0_86 = arith.constant 0 : index
    %c0_87 = arith.constant 0 : index
    %89 = vector.load %arg1[%c0_85, %c0_86, %c0_87] : memref<2x128x128xf32, #tpu.memory_space<vmem>>, vector<1x128x128xf32>
    %90 = vector.shape_cast %89 : vector<1x128x128xf32> to vector<128x128xf32>
    %cst_88 = arith.constant dense<0.000000e+00> : vector<1x128xf32>
    %91 = tpu.matmul %78, %90, %cst_88 {dimension_numbers = #tpu.dot_dimension_numbers<[1], [0], [0], [1], [0, 0, 1, 1], [], []>} : vector<1x128xf32>, vector<128x128xf32>, vector<1x128xf32> -> vector<1x128xf32>
    %c5 = arith.constant 5 : index
    %c0_89 = arith.constant 0 : index
    %92 = vector.load %arg9[%c5, %c0_89] : memref<8x128xf32, #tpu.memory_space<vmem>>, vector<1x128xf32>
    %93 = arith.addf %91, %92 : vector<1x128xf32>
    %94 = math.tanh %93 : vector<1x128xf32>
    %c1_90 = arith.constant 1 : index
    %c0_91 = arith.constant 0 : index
    %c0_92 = arith.constant 0 : index
    %95 = vector.load %arg1[%c1_90, %c0_91, %c0_92] : memref<2x128x128xf32, #tpu.memory_space<vmem>>, vector<1x128x128xf32>
    %96 = vector.shape_cast %95 : vector<1x128x128xf32> to vector<128x128xf32>
    %cst_93 = arith.constant dense<0.000000e+00> : vector<1x128xf32>
    %97 = tpu.matmul %88, %96, %cst_93 {dimension_numbers = #tpu.dot_dimension_numbers<[1], [0], [0], [1], [0, 0, 1, 1], [], []>} : vector<1x128xf32>, vector<128x128xf32>, vector<1x128xf32> -> vector<1x128xf32>
    %c1_94 = arith.constant 1 : index
    %c0_95 = arith.constant 0 : index
    %98 = vector.load %arg5[%c1_94, %c0_95] : memref<2x128xf32, #tpu.memory_space<vmem>>, vector<1x128xf32>
    %99 = arith.addf %97, %98 : vector<1x128xf32>
    %c0_96 = arith.constant 0 : index
    %c0_97 = arith.constant 0 : index
    %c0_98 = arith.constant 0 : index
    %100 = vector.load %arg2[%c0_96, %c0_97, %c0_98] : memref<1x128x128xf32, #tpu.memory_space<vmem>>, vector<1x128x128xf32>
    %101 = vector.shape_cast %100 : vector<1x128x128xf32> to vector<128x128xf32>
    %cst_99 = arith.constant dense<0.000000e+00> : vector<1x128xf32>
    %102 = tpu.matmul %94, %101, %cst_99 {dimension_numbers = #tpu.dot_dimension_numbers<[1], [0], [0], [1], [0, 0, 1, 1], [], []>} : vector<1x128xf32>, vector<128x128xf32>, vector<1x128xf32> -> vector<1x128xf32>
    %103 = arith.addf %99, %102 : vector<1x128xf32>
    %104 = math.tanh %103 : vector<1x128xf32>
    %c0_100 = arith.constant 0 : index
    %c0_101 = arith.constant 0 : index
    %c0_102 = arith.constant 0 : index
    %105 = vector.load %arg1[%c0_100, %c0_101, %c0_102] : memref<2x128x128xf32, #tpu.memory_space<vmem>>, vector<1x128x128xf32>
    %106 = vector.shape_cast %105 : vector<1x128x128xf32> to vector<128x128xf32>
    %cst_103 = arith.constant dense<0.000000e+00> : vector<1x128xf32>
    %107 = tpu.matmul %94, %106, %cst_103 {dimension_numbers = #tpu.dot_dimension_numbers<[1], [0], [0], [1], [0, 0, 1, 1], [], []>} : vector<1x128xf32>, vector<128x128xf32>, vector<1x128xf32> -> vector<1x128xf32>
    %c6 = arith.constant 6 : index
    %c0_104 = arith.constant 0 : index
    %108 = vector.load %arg9[%c6, %c0_104] : memref<8x128xf32, #tpu.memory_space<vmem>>, vector<1x128xf32>
    %109 = arith.addf %107, %108 : vector<1x128xf32>
    %110 = math.tanh %109 : vector<1x128xf32>
    %c1_105 = arith.constant 1 : index
    %c0_106 = arith.constant 0 : index
    %c0_107 = arith.constant 0 : index
    %111 = vector.load %arg1[%c1_105, %c0_106, %c0_107] : memref<2x128x128xf32, #tpu.memory_space<vmem>>, vector<1x128x128xf32>
    %112 = vector.shape_cast %111 : vector<1x128x128xf32> to vector<128x128xf32>
    %cst_108 = arith.constant dense<0.000000e+00> : vector<1x128xf32>
    %113 = tpu.matmul %104, %112, %cst_108 {dimension_numbers = #tpu.dot_dimension_numbers<[1], [0], [0], [1], [0, 0, 1, 1], [], []>} : vector<1x128xf32>, vector<128x128xf32>, vector<1x128xf32> -> vector<1x128xf32>
    %c1_109 = arith.constant 1 : index
    %c0_110 = arith.constant 0 : index
    %114 = vector.load %arg5[%c1_109, %c0_110] : memref<2x128xf32, #tpu.memory_space<vmem>>, vector<1x128xf32>
    %115 = arith.addf %113, %114 : vector<1x128xf32>
    %c0_111 = arith.constant 0 : index
    %c0_112 = arith.constant 0 : index
    %c0_113 = arith.constant 0 : index
    %116 = vector.load %arg2[%c0_111, %c0_112, %c0_113] : memref<1x128x128xf32, #tpu.memory_space<vmem>>, vector<1x128x128xf32>
    %117 = vector.shape_cast %116 : vector<1x128x128xf32> to vector<128x128xf32>
    %cst_114 = arith.constant dense<0.000000e+00> : vector<1x128xf32>
    %118 = tpu.matmul %110, %117, %cst_114 {dimension_numbers = #tpu.dot_dimension_numbers<[1], [0], [0], [1], [0, 0, 1, 1], [], []>} : vector<1x128xf32>, vector<128x128xf32>, vector<1x128xf32> -> vector<1x128xf32>
    %119 = arith.addf %115, %118 : vector<1x128xf32>
    %120 = math.tanh %119 : vector<1x128xf32>
    %c0_115 = arith.constant 0 : index
    %c0_116 = arith.constant 0 : index
    %c0_117 = arith.constant 0 : index
    %121 = vector.load %arg1[%c0_115, %c0_116, %c0_117] : memref<2x128x128xf32, #tpu.memory_space<vmem>>, vector<1x128x128xf32>
    %122 = vector.shape_cast %121 : vector<1x128x128xf32> to vector<128x128xf32>
    %cst_118 = arith.constant dense<0.000000e+00> : vector<1x128xf32>
    %123 = tpu.matmul %110, %122, %cst_118 {dimension_numbers = #tpu.dot_dimension_numbers<[1], [0], [0], [1], [0, 0, 1, 1], [], []>} : vector<1x128xf32>, vector<128x128xf32>, vector<1x128xf32> -> vector<1x128xf32>
    %c7 = arith.constant 7 : index
    %c0_119 = arith.constant 0 : index
    %124 = vector.load %arg9[%c7, %c0_119] : memref<8x128xf32, #tpu.memory_space<vmem>>, vector<1x128xf32>
    %125 = arith.addf %123, %124 : vector<1x128xf32>
    %126 = math.tanh %125 : vector<1x128xf32>
    %c1_120 = arith.constant 1 : index
    %c0_121 = arith.constant 0 : index
    %c0_122 = arith.constant 0 : index
    %127 = vector.load %arg1[%c1_120, %c0_121, %c0_122] : memref<2x128x128xf32, #tpu.memory_space<vmem>>, vector<1x128x128xf32>
    %128 = vector.shape_cast %127 : vector<1x128x128xf32> to vector<128x128xf32>
    %cst_123 = arith.constant dense<0.000000e+00> : vector<1x128xf32>
    %129 = tpu.matmul %120, %128, %cst_123 {dimension_numbers = #tpu.dot_dimension_numbers<[1], [0], [0], [1], [0, 0, 1, 1], [], []>} : vector<1x128xf32>, vector<128x128xf32>, vector<1x128xf32> -> vector<1x128xf32>
    %c1_124 = arith.constant 1 : index
    %c0_125 = arith.constant 0 : index
    %130 = vector.load %arg5[%c1_124, %c0_125] : memref<2x128xf32, #tpu.memory_space<vmem>>, vector<1x128xf32>
    %131 = arith.addf %129, %130 : vector<1x128xf32>
    %c0_126 = arith.constant 0 : index
    %c0_127 = arith.constant 0 : index
    %c0_128 = arith.constant 0 : index
    %132 = vector.load %arg2[%c0_126, %c0_127, %c0_128] : memref<1x128x128xf32, #tpu.memory_space<vmem>>, vector<1x128x128xf32>
    %133 = vector.shape_cast %132 : vector<1x128x128xf32> to vector<128x128xf32>
    %cst_129 = arith.constant dense<0.000000e+00> : vector<1x128xf32>
    %134 = tpu.matmul %126, %133, %cst_129 {dimension_numbers = #tpu.dot_dimension_numbers<[1], [0], [0], [1], [0, 0, 1, 1], [], []>} : vector<1x128xf32>, vector<128x128xf32>, vector<1x128xf32> -> vector<1x128xf32>
    %135 = arith.addf %131, %134 : vector<1x128xf32>
    %136 = math.tanh %135 : vector<1x128xf32>
    %137 = tpu.concatenate %24, %40, %56, %72, %88, %104, %120, %136 in 0 : vector<1x128xf32>, vector<1x128xf32>, vector<1x128xf32>, vector<1x128xf32>, vector<1x128xf32>, vector<1x128xf32>, vector<1x128xf32>, vector<1x128xf32> -> vector<8x128xf32>
    %c0_130 = arith.constant 0 : index
    %c0_131 = arith.constant 0 : index
    %138 = vector.load %arg4[%c0_130, %c0_131] : memref<128x128xf32, #tpu.memory_space<vmem>>, vector<128x128xf32>
    %cst_132 = arith.constant dense<0.000000e+00> : vector<8x128xf32>
    %139 = tpu.matmul %137, %138, %cst_132 {dimension_numbers = #tpu.dot_dimension_numbers<[1], [0], [0], [1], [0, 0, 1, 1], [], []>} : vector<8x128xf32>, vector<128x128xf32>, vector<8x128xf32> -> vector<8x128xf32>
    %c0_133 = arith.constant 0 : index
    %c0_134 = arith.constant 0 : index
    %140 = vector.load %arg6[%c0_133, %c0_134] : memref<1x128xf32, #tpu.memory_space<vmem>>, vector<1x128xf32>
    %141 = vector.broadcast %140 : vector<1x128xf32> to vector<8x128xf32>
    %142 = arith.addf %139, %141 : vector<8x128xf32>
    %c0_135 = arith.constant 0 : index
    %c0_136 = arith.constant 0 : index
    %143 = vector.load %arg7[%c0_135, %c0_136] : memref<8x128xf32, #tpu.memory_space<vmem>>, vector<8x128xf32>
    tpu.vector_store %arg7[%c0_135, %c0_136], %142 {strides = array<i32>} : memref<8x128xf32, #tpu.memory_space<vmem>>, vector<8x128xf32>,
    %144 = tpu.concatenate %126, %136 in 0 : vector<1x128xf32>, vector<1x128xf32> -> vector<2x128xf32>
    %c0_137 = arith.constant 0 : index
    %c0_138 = arith.constant 0 : index
    %145 = vector.load %arg8[%c0_137, %c0_138] : memref<2x128xf32, #tpu.memory_space<vmem>>, vector<2x128xf32>
    tpu.vector_store %arg8[%c0_137, %c0_138], %144 {strides = array<i32>} : memref<2x128xf32, #tpu.memory_space<vmem>>, vector<2x128xf32>,
    return
  }
}

</mosaic_0001>

<bundles_post_ra>
// kernel: tpu_custom_call.1
= control target key start
LH: loop header
LB: loop body
LE: loop exit
PB: predicated region body
PF: predicated region fallthrough
CT: control target
= control target key end

     0   :  { %14 = vsyncpa [#allocation4], 0  ;;  %s4904_s0 = inlined_call_operand.hbm [shape: f32[8,128], index: 0, kind: input, shape index: {}]   ;;  %s4905_s1 = inlined_call_operand.hbm [shape: f32[2,128,128], index: 1, kind: input, shape index: {}]   ;;  %s4906_s2 = inlined_call_operand.hbm [shape: f32[1,128,128], index: 2, kind: input, shape index: {}]   ;;  %s4907_s3 = inlined_call_operand.hbm [shape: f32[128,128], index: 3, kind: input, shape index: {}]   ;;  %s4908_s4 = inlined_call_operand.hbm [shape: f32[128,128], index: 4, kind: input, shape index: {}]   ;;  %s4909_s5 = inlined_call_operand.vmem [shape: f32[2,128], index: 5, kind: input, shape index: {}]   ;;  %s4910_s6 = inlined_call_operand.vmem [shape: f32[1,128], index: 6, kind: input, shape index: {}]   ;;  %s4911_s7 = inlined_call_operand.hbm [shape: f32[8,128], index: 7, kind: output, shape index: {0}]   ;;  %s4912_s8 = inlined_call_operand.hbm [shape: f32[2,128], index: 8, kind: output, shape index: {1}]  }
   0x1   :  { %15 = vsyncpa [#allocation7], 0 }
   0x2   :  { %16 = vsyncpa [#allocation10], 0 }
   0x3   :  { %17 = vsyncpa [#allocation5], 0 }
   0x4   :  { %18 = vsyncpa [#allocation14], 0  ;;  %s3711_s27 = smov [#allocation6]  }
   0x5   :  { %s34_s28 = sshll.u32 %s3711_s27, 4  ;;  %s35_s28 = int_to_ptr.vmem [resolvable:$true] %s34_s28 }
   0x6   :  { %s3569_s29 = scalar_lea.vmem %s35_s28, 4096  ;;  %p3574_p1 = scmp.lt.s32.totalorder %s35_s28, %s35_s28 }
   0x7   :  { %p3570_p0 = scmp.ne.s32.totalorder %s35_s28, %s3569_s29  ;;  %p3575_p2 = scmp.lt.s32.totalorder %s3569_s29, %s3569_s29 }
   0x9   :  { %p3576_p3 = por %p3575_p2, %p3574_p1 }
   0xb   :  { %p3577_p4 = pnand %p3576_p3, %p3570_p0 }
   0xd   :  { %3580 = shalt.err (!%p3577_p4)
}
   0xe   :  { %s3712_s30 = smov 128   ;;  %s3713_s9 = smov 8  }
   0xf   :  { %40 = dma.hbm_to_vmem [thread:$0]  %s4905_s1, 4096, %s35_s28, [#allocation7], %s3712_s30, %s3712_s30, %s3713_s9  }
  0x10   :  { %s3714_s12 = smov [#allocation9]   ;;  %s3715_s14 = smov [#allocation3]  }
  0x11   :  { %s58_s13 = sshll.u32 %s3714_s12, 4  ;;  %s25_s15 = sshll.u32 %s3715_s14, 4  ;;  %s59_s13 = int_to_ptr.vmem [resolvable:$true] %s58_s13  ;;  %s26_s15 = int_to_ptr.vmem [resolvable:$true] %s25_s15 }
  0x12   :  { %s3589_s16 = scalar_lea.vmem %s59_s13, 2048  ;;  %p3594_p6 = scmp.lt.s32.totalorder %s59_s13, %s59_s13 }
  0x13   :  { %p3590_p5 = scmp.ne.s32.totalorder %s59_s13, %s3589_s16  ;;  %p3595_p7 = scmp.lt.s32.totalorder %s3589_s16, %s3589_s16 }
  0x15   :  { %p3596_p8 = por %p3595_p7, %p3594_p6 }
  0x17   :  { %p3597_p9 = pnand %p3596_p8, %p3590_p5 }
  0x19   :  { %3600 = shalt.err (!%p3597_p9)
}
  0x1a   :  { %64 = dma.hbm_to_vmem [thread:$0]  %s4907_s3, 2048, %s59_s13, [#allocation10], %s3712_s30, %s3712_s30, %s3713_s9  }
  0x1b   :  { %s3609_s1 = scalar_lea.vmem %s26_s15, 128  ;;  %p3614_p11 = scmp.lt.s32.totalorder %s26_s15, %s26_s15 }
  0x1c   :  { %p3610_p10 = scmp.ne.s32.totalorder %s26_s15, %s3609_s1  ;;  %p3615_p12 = scmp.lt.s32.totalorder %s3609_s1, %s3609_s1 }
  0x1e   :  { %p3616_p13 = por %p3615_p12, %p3614_p11 }
  0x20   :  { %p3617_p0 = pnand %p3616_p13, %p3610_p10 }
  0x22   :  { %3620 = shalt.err (!%p3617_p0)
}
  0x23   :  { %28 = dma.hbm_to_vmem [thread:$0]  %s4904_s0, 128, %s26_s15, [#allocation4]  }
  0x24   :  { %s3716_s21 = smov [#allocation8]   ;;  %s3717_s23 = smov [#allocation11]  }
  0x25   :  { %s46_s22 = sshll.u32 %s3716_s21, 4  ;;  %s70_s24 = sshll.u32 %s3717_s23, 4  ;;  %s47_s22 = int_to_ptr.vmem [resolvable:$true] %s46_s22  ;;  %s71_s24 = int_to_ptr.vmem [resolvable:$true] %s70_s24 }
  0x26   :  { %s3629_s25 = scalar_lea.vmem %s47_s22, 2048  ;;  %p3634_p2 = scmp.lt.s32.totalorder %s47_s22, %s47_s22 }
  0x27   :  { %p3630_p1 = scmp.ne.s32.totalorder %s47_s22, %s3629_s25  ;;  %p3635_p3 = scmp.lt.s32.totalorder %s3629_s25, %s3629_s25 }
  0x29   :  { %p3636_p4 = por %p3635_p3, %p3634_p2 }
  0x2b   :  { %p3637_p5 = pnand %p3636_p4, %p3630_p1 }
  0x2d   :  { %3640 = shalt.err (!%p3637_p5)
}
  0x2e   :  { %52 = dma.hbm_to_vmem [thread:$0]  %s4906_s2, 2048, %s47_s22, [#allocation7], %s3712_s30, %s3712_s30, %s3713_s9  }
  0x2f   :  { %s3649_s0 = scalar_lea.vmem %s71_s24, 2048  ;;  %p3654_p7 = scmp.lt.s32.totalorder %s71_s24, %s71_s24 }
  0x30   :  { %p3650_p6 = scmp.ne.s32.totalorder %s71_s24, %s3649_s0  ;;  %p3655_p8 = scmp.lt.s32.totalorder %s3649_s0, %s3649_s0 }
  0x32   :  { %p3656_p9 = por %p3655_p8, %p3654_p7 }
  0x34   :  { %p3657_p10 = pnand %p3656_p9, %p3650_p6 }
  0x36   :  { %3660 = shalt.err (!%p3657_p10)
}
  0x37   :  { %76 = dma.hbm_to_vmem [thread:$0]  %s4908_s4, 2048, %s71_s24, [#allocation10], %s3712_s30, %s3712_s30, %s3713_s9  }
  0x38   :  { %3701 = dma.done.wait [#allocation4], 128  }
  0x39   :  { %3702 = vsyncadd [#allocation4], 4294967168 }
  0x3a   :  { %3703 = dma.done.wait [#allocation7], 6144  }
  0x3b   :  { %3704 = vsyncadd [#allocation7], 4294961152 }
  0x3c   :  { %3705 = dma.done.wait [#allocation10], 4096  }
  0x3d   :  { %3706 = vsyncadd [#allocation10], 4294963200  ;;  %v3718_v0 = vmov 0.0   ;;  %vm3719_vm0 = vmmov 0   ;;  %v112_v1 = vld [vmem:[#allocation9 + $0x78] sm:$0xff]  ;;  %v111_v2 = vld [vmem:[#allocation9 + $0x70] sm:$0xff] }
  0x3e   :  { %2559 = vmatprep.subr.mxu0 %v3718_v0  ;;  %2594 = vmatprep.subr.mxu1 %v3718_v0  ;;  %v3800_v3 = vld [vmem:[#allocation6 + $0x78] sm:$0xff]  ;;  %v110_v4 = vld [vmem:[#allocation9 + $0x68] sm:$0xff]  ;;  %v3804_v5 = vld [vmem:[#allocation6 + $0x70] sm:$0xff]  ;;  %vm1972_vm1 = vcmask 1040384   ;;  %vm1974_vm2 = vcmask 1041408   ;;  %vm1976_vm3 = vcmask 1042432  }
  0x3f   :  { %2591 = vmatprep.mubr.msk.f32.mxu0 %vm3719_vm0, %v3718_v0  ;;  %2626 = vmatprep.mubr.msk.f32.mxu1 %vm3719_vm0, %v3718_v0  ;;  %v3807_v6 = vld [vmem:[#allocation6 + $0x68] sm:$0xff]  ;;  %v109_v7 = vld [vmem:[#allocation9 + $0x60] sm:$0xff]  ;;  %v108_v9 = vld [vmem:[#allocation9 + $0x58] sm:$0xff]  ;;  %vm1978_vm4 = vcmask 1043456   ;;  %vm1980_vm5 = vcmask 1044480   ;;  %vm1982_vm6 = vcmask 1045504  }
  0x40   :  { %2560 = vmatpush3.msra.mxu0 %v112_v1  ;;  %2595 = vmatpush3.msra.mxu1 %v3800_v3  ;;  %v3812_v8 = vld [vmem:[#allocation6 + $0x60] sm:$0xff]  ;;  %v3817_v10 = vld [vmem:[#allocation6 + $0x58] sm:$0xff]  ;;  %v107_v11 = vld [vmem:[#allocation9 + $0x50] sm:$0xff]  ;;  %vm1984_vm7 = vcmask 1046528  }
  0x41   :  { %2561 = vmatprep.subr.mxu0 %v3718_v0  ;;  %2596 = vmatprep.subr.mxu1 %v3718_v0  ;;  %v3822_v12 = vld [vmem:[#allocation6 + $0x50] sm:$0xff]  ;;  %v106_v13 = vld [vmem:[#allocation9 + $0x48] sm:$0xff]  ;;  %v105_v15 = vld [vmem:[#allocation9 + $0x40] sm:$0xff] }
  0x42   :  { %2562 = vmatpush3.msra.mxu0 %v111_v2  ;;  %2597 = vmatpush3.msra.mxu1 %v3804_v5  ;;  %v3827_v14 = vld [vmem:[#allocation6 + $0x48] sm:$0xff]  ;;  %v3832_v16 = vld [vmem:[#allocation6 + $0x40] sm:$0xff]  ;;  %v104_v17 = vld [vmem:[#allocation9 + $0x38] sm:$0xff] }
  0x43   :  { %2563 = vmatprep.subr.mxu0 %v3718_v0  ;;  %2598 = vmatprep.subr.mxu1 %v3718_v0  ;;  %v3837_v18 = vld [vmem:[#allocation6 + $0x38] sm:$0xff]  ;;  %v103_v19 = vld [vmem:[#allocation9 + $0x30] sm:$0xff]  ;;  %v102_v21 = vld [vmem:[#allocation9 + $0x28] sm:$0xff] }
  0x44   :  { %2564 = vmatpush3.msra.mxu0 %v110_v4  ;;  %2599 = vmatpush3.msra.mxu1 %v3807_v6  ;;  %v3842_v20 = vld [vmem:[#allocation6 + $0x30] sm:$0xff]  ;;  %v3847_v22 = vld [vmem:[#allocation6 + $0x28] sm:$0xff]  ;;  %v101_v23 = vld [vmem:[#allocation9 + $0x20] sm:$0xff] }
  0x45   :  { %2565 = vmatprep.subr.mxu0 %v3718_v0  ;;  %2600 = vmatprep.subr.mxu1 %v3718_v0  ;;  %v3852_v24 = vld [vmem:[#allocation6 + $0x20] sm:$0xff]  ;;  %v100_v25 = vld [vmem:[#allocation9 + $0x18] sm:$0xff]  ;;  %v99_v27 = vld [vmem:[#allocation9 + $0x10] sm:$0xff] }
  0x46   :  { %2566 = vmatpush3.msra.mxu0 %v109_v7  ;;  %2601 = vmatpush3.msra.mxu1 %v3812_v8  ;;  %v3857_v26 = vld [vmem:[#allocation6 + $0x18] sm:$0xff]  ;;  %v3862_v28 = vld [vmem:[#allocation6 + $0x10] sm:$0xff]  ;;  %v98_v29 = vld [vmem:[#allocation9 + $0x8] sm:$0xff] }
  0x47   :  { %2567 = vmatprep.subr.mxu0 %v3718_v0  ;;  %2602 = vmatprep.subr.mxu1 %v3718_v0  ;;  %v3867_v30 = vld [vmem:[#allocation6 + $0x8] sm:$0xff]  ;;  %v97_v31 = vld [vmem:[#allocation9] sm:$0xff]  ;;  %v96_v32 = vld [vmem:[#allocation3] sm:$0xff] }
  0x48   :  { %2568 = vmatpush3.msra.mxu0 %v108_v9  ;;  %2603 = vmatpush3.msra.mxu1 %v3817_v10  ;;  %v3872_v33 = vld [vmem:[#allocation6] sm:$0xff]  ;;  %v3877_v34 = vld [vmem:[#allocation6 + $0xf8] sm:$0xff]  ;;  %v3882_v35 = vld [vmem:[#allocation6 + $0xf0] sm:$0xff] }
  0x49   :  { %2569 = vmatprep.subr.mxu0 %v3718_v0  ;;  %2604 = vmatprep.subr.mxu1 %v3718_v0  ;;  %v3884_v36 = vld [vmem:[#allocation8 + $0x78] sm:$0xff]  ;;  %v3890_v37 = vld [vmem:[#allocation6 + $0xe8] sm:$0xff]  ;;  %v3893_v38 = vld [vmem:[#allocation8 + $0x70] sm:$0xff] }
  0x4a   :  { %2570 = vmatpush3.msra.mxu0 %v107_v11  ;;  %2605 = vmatpush3.msra.mxu1 %v3822_v12  ;;  %v3898_v39 = vld [vmem:[#allocation6 + $0xe0] sm:$0xff]  ;;  %v3904_v40 = vld [vmem:[#allocation6 + $0xd8] sm:$0xff]  ;;  %v3911_v41 = vld [vmem:[#allocation6 + $0xd0] sm:$0xff] }
  0x4b   :  { %2571 = vmatprep.subr.mxu0 %v3718_v0  ;;  %2606 = vmatprep.subr.mxu1 %v3718_v0  ;;  %v3915_v42 = vld [vmem:[#allocation6 + $0xc8] sm:$0xff]  ;;  %v3919_v43 = vld [vmem:[#allocation6 + $0xc0] sm:$0xff]  ;;  %v3923_v44 = vld [vmem:[#allocation6 + $0xb8] sm:$0xff] }
  0x4c   :  { %2572 = vmatpush3.msra.mxu0 %v106_v13  ;;  %2607 = vmatpush3.msra.mxu1 %v3827_v14  ;;  %v3927_v45 = vld [vmem:[#allocation6 + $0xb0] sm:$0xff]  ;;  %v3931_v46 = vld [vmem:[#allocation6 + $0xa8] sm:$0xff]  ;;  %v3935_v47 = vld [vmem:[#allocation6 + $0xa0] sm:$0xff] }
  0x4d   :  { %2573 = vmatprep.subr.mxu0 %v3718_v0  ;;  %2608 = vmatprep.subr.mxu1 %v3718_v0  ;;  %v3939_v48 = vld [vmem:[#allocation6 + $0x98] sm:$0xff]  ;;  %v3943_v49 = vld [vmem:[#allocation6 + $0x90] sm:$0xff]  ;;  %v3947_v50 = vld [vmem:[#allocation6 + $0x88] sm:$0xff] }
  0x4e   :  { %2574 = vmatpush3.msra.mxu0 %v105_v15  ;;  %2609 = vmatpush3.msra.mxu1 %v3832_v16  ;;  %v3951_v51 = vld [vmem:[#allocation6 + $0x80] sm:$0xff]  ;;  %v3989_v52 = vld [vmem:[#allocation8 + $0x68] sm:$0xff]  ;;  %v4000_v54 = vld [vmem:[#allocation8 + $0x58] sm:$0xff] }
  0x4f   :  { %2575 = vmatprep.subr.mxu0 %v3718_v0  ;;  %2610 = vmatprep.subr.mxu1 %v3718_v0  ;;  %v3995_v53 = vld [vmem:[#allocation8 + $0x60] sm:$0xff]  ;;  %v4002_v55 = vld [vmem:[#allocation8 + $0x50] sm:$0xff]  ;;  %v4008_v56 = vld [vmem:[#allocation8 + $0x48] sm:$0xff] }
  0x50   :  { %2576 = vmatpush3.msra.mxu0 %v104_v17  ;;  %2611 = vmatpush3.msra.mxu1 %v3837_v18  ;;  %v4012_v57 = vld [vmem:[#allocation8 + $0x40] sm:$0xff]  ;;  %v4016_v58 = vld [vmem:[#allocation8 + $0x38] sm:$0xff]  ;;  %v4020_v59 = vld [vmem:[#allocation8 + $0x30] sm:$0xff] }
  0x51   :  { %2577 = vmatprep.subr.mxu0 %v3718_v0  ;;  %2612 = vmatprep.subr.mxu1 %v3718_v0  ;;  %v4022_v60 = vld [vmem:[#allocation8 + $0x28] sm:$0xff]  ;;  %v4026_v61 = vld [vmem:[#allocation8 + $0x20] sm:$0xff]  ;;  %v4030_v62 = vld [vmem:[#allocation8 + $0x18] sm:$0xff] }
  0x52   :  { %2578 = vmatpush3.msra.mxu0 %v103_v19  ;;  %2613 = vmatpush3.msra.mxu1 %v3842_v20  ;;  %v4034_v63 = vld [vmem:[#allocation8 + $0x10] sm:$0xff]  ;;  %v4038_v1 = vld [vmem:[#allocation8 + $0x8] sm:$0xff]  ;;  %v4042_v2 = vld [vmem:[#allocation8] sm:$0xff] }
  0x53   :  { %2579 = vmatprep.subr.mxu0 %v3718_v0  ;;  %2614 = vmatprep.subr.mxu1 %v3718_v0  ;;  %v2115_v4 = vld [vmem:[%s4909_s5] ss:$0 sm:$0xff] }
  0x54   :  { %2580 = vmatpush3.msra.mxu0 %v102_v21  ;;  %2615 = vmatpush3.msra.mxu1 %v3847_v22 }
  0x55   :  { %2581 = vmatprep.subr.mxu0 %v3718_v0  ;;  %2616 = vmatprep.subr.mxu1 %v3718_v0 }
  0x56   :  { %2582 = vmatpush3.msra.mxu0 %v101_v23  ;;  %2617 = vmatpush3.msra.mxu1 %v3852_v24 }
  0x57   :  { %2583 = vmatprep.subr.mxu0 %v3718_v0  ;;  %2618 = vmatprep.subr.mxu1 %v3718_v0 }
  0x58   :  { %2584 = vmatpush3.msra.mxu0 %v100_v25  ;;  %2619 = vmatpush3.msra.mxu1 %v3857_v26 }
  0x59   :  { %2585 = vmatprep.subr.mxu0 %v3718_v0  ;;  %2620 = vmatprep.subr.mxu1 %v3718_v0 }
  0x5a   :  { %2586 = vmatpush3.msra.mxu0 %v99_v27  ;;  %2621 = vmatpush3.msra.mxu1 %v3862_v28  ;;  %v4122_v27 = vld [vmem:[%s4909_s5 + $0x1] sm:$0x1] }
  0x5b   :  { %2587 = vmatprep.subr.mxu0 %v3718_v0  ;;  %2622 = vmatprep.subr.mxu1 %v3718_v0 }
  0x5c   :  { %2588 = vmatpush3.msra.mxu0 %v98_v29  ;;  %2623 = vmatpush3.msra.mxu1 %v3867_v30 }
  0x5d   :  { %2589 = vmatprep.subr.mxu0 %v3718_v0  ;;  %2624 = vmatprep.subr.mxu1 %v3718_v0 }
  0x5e   :  { %2590 = vmatpush3.msra.mxu0 %v97_v31  ;;  %2625 = vmatpush3.msra.mxu1 %v3872_v33 }
  0x5f   :  { %2592 = vmatmul.mubr.f32.vlgmr.msra.gmra.mxu0 %v96_v32  ;;  %2627 = vmatmul.mubr.f32.vlgmr.msra.gmra.mxu1 %v3718_v0 }
  0x60   :  { %2629 = vmatprep.subr.mxu0 %v3718_v0  ;;  %2661 = vmatprep.mubr.msk.f32.mxu0 %vm3719_vm0, %v3718_v0 }
  0x61   :  { %2630 = vmatpush3.msra.mxu0 %v3877_v34  ;;  %2664 = vmatprep.subr.mxu1 %v3718_v0 }
  0x62   :  { %2631 = vmatprep.subr.mxu0 %v3718_v0  ;;  %2665 = vmatpush3.msra.mxu1 %v3884_v36 }
  0x63   :  { %2632 = vmatpush3.msra.mxu0 %v3882_v35  ;;  %2666 = vmatprep.subr.mxu1 %v3718_v0 }
  0x64   :  { %2633 = vmatprep.subr.mxu0 %v3718_v0  ;;  %2667 = vmatpush3.msra.mxu1 %v3893_v38 }
  0x65   :  { %2634 = vmatpush3.msra.mxu0 %v3890_v37  ;;  %2668 = vmatprep.subr.mxu1 %v3718_v0 }
  0x66   :  { %2635 = vmatprep.subr.mxu0 %v3718_v0  ;;  %2696 = vmatprep.mubr.msk.f32.mxu1 %vm3719_vm0, %v3718_v0 }
  0x67   :  { %2636 = vmatpush3.msra.mxu0 %v3898_v39  ;;  %2669 = vmatpush3.msra.mxu1 %v3989_v52 }
  0x68   :  { %2637 = vmatprep.subr.mxu0 %v3718_v0  ;;  %2670 = vmatprep.subr.mxu1 %v3718_v0 }
  0x69   :  { %2638 = vmatpush3.msra.mxu0 %v3904_v40  ;;  %2671 = vmatpush3.msra.mxu1 %v3995_v53 }
  0x6a   :  { %2639 = vmatprep.subr.mxu0 %v3718_v0  ;;  %2672 = vmatprep.subr.mxu1 %v3718_v0 }
  0x6b   :  { %2640 = vmatpush3.msra.mxu0 %v3911_v41  ;;  %2673 = vmatpush3.msra.mxu1 %v4000_v54 }
  0x6c   :  { %2641 = vmatprep.subr.mxu0 %v3718_v0  ;;  %2674 = vmatprep.subr.mxu1 %v3718_v0 }
  0x6d   :  { %2642 = vmatpush3.msra.mxu0 %v3915_v42  ;;  %2675 = vmatpush3.msra.mxu1 %v4002_v55 }
  0x6e   :  { %2643 = vmatprep.subr.mxu0 %v3718_v0  ;;  %2676 = vmatprep.subr.mxu1 %v3718_v0 }
  0x6f   :  { %2644 = vmatpush3.msra.mxu0 %v3919_v43  ;;  %2677 = vmatpush3.msra.mxu1 %v4008_v56 }
  0x70   :  { %2645 = vmatprep.subr.mxu0 %v3718_v0  ;;  %2678 = vmatprep.subr.mxu1 %v3718_v0 }
  0x71   :  { %2646 = vmatpush3.msra.mxu0 %v3923_v44  ;;  %2679 = vmatpush3.msra.mxu1 %v4012_v57 }
  0x72   :  { %2647 = vmatprep.subr.mxu0 %v3718_v0  ;;  %2680 = vmatprep.subr.mxu1 %v3718_v0 }
  0x73   :  { %2648 = vmatpush3.msra.mxu0 %v3927_v45  ;;  %2681 = vmatpush3.msra.mxu1 %v4016_v58 }
  0x74   :  { %2649 = vmatprep.subr.mxu0 %v3718_v0  ;;  %2682 = vmatprep.subr.mxu1 %v3718_v0 }
  0x75   :  { %2650 = vmatpush3.msra.mxu0 %v3931_v46  ;;  %2683 = vmatpush3.msra.mxu1 %v4020_v59 }
  0x76   :  { %2651 = vmatprep.subr.mxu0 %v3718_v0  ;;  %2684 = vmatprep.subr.mxu1 %v3718_v0 }
  0x77   :  { %2652 = vmatpush3.msra.mxu0 %v3935_v47  ;;  %2685 = vmatpush3.msra.mxu1 %v4022_v60 }
  0x78   :  { %2653 = vmatprep.subr.mxu0 %v3718_v0  ;;  %2686 = vmatprep.subr.mxu1 %v3718_v0 }
  0x79   :  { %2654 = vmatpush3.msra.mxu0 %v3939_v48  ;;  %2687 = vmatpush3.msra.mxu1 %v4026_v61 }
  0x7a   :  { %2655 = vmatprep.subr.mxu0 %v3718_v0  ;;  %2688 = vmatprep.subr.mxu1 %v3718_v0 }
  0x7b   :  { %2656 = vmatpush3.msra.mxu0 %v3943_v49  ;;  %2689 = vmatpush3.msra.mxu1 %v4030_v62 }
  0x7c   :  { %2657 = vmatprep.subr.mxu0 %v3718_v0  ;;  %2690 = vmatprep.subr.mxu1 %v3718_v0 }
  0x7d   :  { %2658 = vmatpush3.msra.mxu0 %v3947_v50  ;;  %2691 = vmatpush3.msra.mxu1 %v4034_v63 }
  0x7e   :  { %2659 = vmatprep.subr.mxu0 %v3718_v0  ;;  %2692 = vmatprep.subr.mxu1 %v3718_v0 }
  0x7f   :  { %2660 = vmatpush3.msra.mxu0 %v3951_v51  ;;  %2693 = vmatpush3.msra.mxu1 %v4038_v1 }
  0x80   :  { %2699 = vmatprep.subr.mxu0 %v3718_v0  ;;  %2662 = vmatmul.mubr.f32.vlgmr.msra.gmra.mxu0 %v3718_v0 }
  0x81   :  { %2700 = vmatpush3.msra.mxu0 %v3800_v3  ;;  %2731 = vmatprep.mubr.msk.f32.mxu0 %vm3719_vm0, %v3718_v0 }
  0x82   :  { %2701 = vmatprep.subr.mxu0 %v3718_v0  ;;  %2694 = vmatprep.subr.mxu1 %v3718_v0 }
  0x83   :  { %2702 = vmatpush3.msra.mxu0 %v3804_v5  ;;  %2695 = vmatpush3.msra.mxu1 %v4042_v2 }
  0x84   :  { %2703 = vmatprep.subr.mxu0 %v3718_v0  ;;  %2734 = vmatprep.subr.mxu1 %v3718_v0 }
  0x85   :  { %2704 = vmatpush3.msra.mxu0 %v3807_v6 }
  0x86   :  { %2705 = vmatprep.subr.mxu0 %v3718_v0 }
  0x87   :  { %2706 = vmatpush3.msra.mxu0 %v3812_v8 }
  0x88   :  { %2707 = vmatprep.subr.mxu0 %v3718_v0 }
  0x89   :  { %2708 = vmatpush3.msra.mxu0 %v3817_v10 }
  0x8a   :  { %2709 = vmatprep.subr.mxu0 %v3718_v0 }
  0x8b   :  { %2710 = vmatpush3.msra.mxu0 %v3822_v12 }
  0x8c   :  { %2711 = vmatprep.subr.mxu0 %v3718_v0 }
  0x8d   :  { %2712 = vmatpush3.msra.mxu0 %v3827_v14 }
  0x8e   :  { %2713 = vmatprep.subr.mxu0 %v3718_v0 }
  0x8f   :  { %2714 = vmatpush3.msra.mxu0 %v3832_v16 }
  0x90   :  { %2715 = vmatprep.subr.mxu0 %v3718_v0 }
  0x91   :  { %2716 = vmatpush3.msra.mxu0 %v3837_v18 }
  0x92   :  { %2717 = vmatprep.subr.mxu0 %v3718_v0 }
  0x93   :  { %2718 = vmatpush3.msra.mxu0 %v3842_v20 }
  0x94   :  { %2719 = vmatprep.subr.mxu0 %v3718_v0 }
  0x95   :  { %2720 = vmatpush3.msra.mxu0 %v3847_v22 }
  0x96   :  { %2721 = vmatprep.subr.mxu0 %v3718_v0 }
  0x97   :  { %2722 = vmatpush3.msra.mxu0 %v3852_v24 }
  0x98   :  { %2723 = vmatprep.subr.mxu0 %v3718_v0 }
  0x99   :  { %2724 = vmatpush3.msra.mxu0 %v3857_v26 }
  0x9a   :  { %2725 = vmatprep.subr.mxu0 %v3718_v0 }
  0x9b   :  { %2726 = vmatpush3.msra.mxu0 %v3862_v28 }
  0x9c   :  { %2727 = vmatprep.subr.mxu0 %v3718_v0 }
  0x9d   :  { %2728 = vmatpush3.msra.mxu0 %v3867_v30 }
  0x9e   :  { %2729 = vmatprep.subr.mxu0 %v3718_v0 }
  0x9f   :  { %2730 = vmatpush3.msra.mxu0 %v3872_v33 }
  0xa0   :  { %2769 = vmatprep.subr.mxu0 %v3718_v0 }
 0x11f   :  { %v184_v7 = vpop.f32.mrf.mxu0  ;;  %v272_v11 = vpop.f32.mrf.mxu1 }
 0x120   :  { %v185_v9 = vadd.f32 %v2115_v4, %v184_v7 }
 0x121   :  { %v2593_v13 = vpop.f32.mrf.mxu0  ;;  %v2628_v15 = vpop.f32.mrf.mxu1 }
 0x122   :  { %188 = vst [vmem:[#allocation2] sm:$0xff] %v185_v9 }
 0x129   :  { %v205_v17 = vld [vmem:[#allocation2] sm:$0x1]  ;;  %v453_v32 = vld [vmem:[#allocation2 + $0x1] sm:$0x1] }
 0x12a   :  { %v273_v19 = vadd.f32 %v272_v11, %v205_v17 }
 0x12c   :  { %3480 = vtanh.f32 %v273_v19 }
 0x139   :  { %v3481_v21 = vpop.eup %3480 }
 0x13a   :  { %2697 = vmatmul.mubr.f32.vlgmr.msra.gmra.mxu1 %v3481_v21  ;;  %2732 = vmatmul.mubr.f32.vlgmr.msra.gmra.mxu0 %v3481_v21 }
 0x13b   :  { %2735 = vmatpush3.msra.mxu1 %v3877_v34  ;;  %2770 = vmatpush3.msra.mxu0 %v3884_v36 }
 0x13c   :  { %2736 = vmatprep.subr.mxu1 %v3718_v0  ;;  %2771 = vmatprep.subr.mxu0 %v3718_v0 }
 0x13d   :  { %2737 = vmatpush3.msra.mxu1 %v3882_v35  ;;  %2772 = vmatpush3.msra.mxu0 %v3893_v38 }
 0x13e   :  { %2738 = vmatprep.subr.mxu1 %v3718_v0  ;;  %2773 = vmatprep.subr.mxu0 %v3718_v0 }
 0x13f   :  { %2739 = vmatpush3.msra.mxu1 %v3890_v37  ;;  %2774 = vmatpush3.msra.mxu0 %v3989_v52 }
 0x140   :  { %v361_v23 = vpop.f32.mrf.mxu0  ;;  %2740 = vmatprep.subr.mxu1 %v3718_v0  ;;  %2775 = vmatprep.subr.mxu0 %v3718_v0 }
 0x141   :  { %2741 = vmatpush3.msra.mxu1 %v3898_v39  ;;  %2776 = vmatpush3.msra.mxu0 %v3995_v53  ;;  %v362_v29 = vadd.f32 %v361_v23, %v4122_v27 }
 0x142   :  { %v2663_v25 = vpop.f32.mrf.mxu0  ;;  %2742 = vmatprep.subr.mxu1 %v3718_v0  ;;  %2777 = vmatprep.subr.mxu0 %v3718_v0 }
 0x143   :  { %2743 = vmatpush3.msra.mxu1 %v3904_v40  ;;  %2778 = vmatpush3.msra.mxu0 %v4000_v54 }
 0x144   :  { %2744 = vmatprep.subr.mxu1 %v3718_v0  ;;  %2779 = vmatprep.subr.mxu0 %v3718_v0 }
 0x145   :  { %2745 = vmatpush3.msra.mxu1 %v3911_v41  ;;  %2780 = vmatpush3.msra.mxu0 %v4002_v55 }
 0x146   :  { %2746 = vmatprep.subr.mxu1 %v3718_v0  ;;  %2781 = vmatprep.subr.mxu0 %v3718_v0 }
 0x147   :  { %2747 = vmatpush3.msra.mxu1 %v3915_v42  ;;  %2782 = vmatpush3.msra.mxu0 %v4008_v56 }
 0x148   :  { %2748 = vmatprep.subr.mxu1 %v3718_v0  ;;  %2783 = vmatprep.subr.mxu0 %v3718_v0 }
 0x149   :  { %2749 = vmatpush3.msra.mxu1 %v3919_v43  ;;  %2784 = vmatpush3.msra.mxu0 %v4012_v57 }
 0x14a   :  { %2750 = vmatprep.subr.mxu1 %v3718_v0  ;;  %2785 = vmatprep.subr.mxu0 %v3718_v0 }
 0x14b   :  { %2751 = vmatpush3.msra.mxu1 %v3923_v44  ;;  %2786 = vmatpush3.msra.mxu0 %v4016_v58 }
 0x14c   :  { %2752 = vmatprep.subr.mxu1 %v3718_v0  ;;  %2787 = vmatprep.subr.mxu0 %v3718_v0 }
 0x14d   :  { %2753 = vmatpush3.msra.mxu1 %v3927_v45  ;;  %2788 = vmatpush3.msra.mxu0 %v4020_v59 }
 0x14e   :  { %2754 = vmatprep.subr.mxu1 %v3718_v0  ;;  %2789 = vmatprep.subr.mxu0 %v3718_v0 }
 0x14f   :  { %2755 = vmatpush3.msra.mxu1 %v3931_v46  ;;  %2790 = vmatpush3.msra.mxu0 %v4022_v60 }
 0x150   :  { %2756 = vmatprep.subr.mxu1 %v3718_v0  ;;  %2791 = vmatprep.subr.mxu0 %v3718_v0 }
 0x151   :  { %2757 = vmatpush3.msra.mxu1 %v3935_v47  ;;  %2792 = vmatpush3.msra.mxu0 %v4026_v61 }
 0x152   :  { %2758 = vmatprep.subr.mxu1 %v3718_v0  ;;  %2793 = vmatprep.subr.mxu0 %v3718_v0 }
 0x153   :  { %2759 = vmatpush3.msra.mxu1 %v3939_v48  ;;  %2794 = vmatpush3.msra.mxu0 %v4030_v62 }
 0x154   :  { %2760 = vmatprep.subr.mxu1 %v3718_v0  ;;  %2795 = vmatprep.subr.mxu0 %v3718_v0 }
 0x155   :  { %2761 = vmatpush3.msra.mxu1 %v3943_v49  ;;  %2796 = vmatpush3.msra.mxu0 %v4034_v63 }
 0x156   :  { %2762 = vmatprep.subr.mxu1 %v3718_v0  ;;  %2797 = vmatprep.subr.mxu0 %v3718_v0 }
 0x157   :  { %2763 = vmatpush3.msra.mxu1 %v3947_v50  ;;  %2798 = vmatpush3.msra.mxu0 %v4038_v1 }
 0x158   :  { %2764 = vmatprep.subr.mxu1 %v3718_v0  ;;  %2799 = vmatprep.subr.mxu0 %v3718_v0 }
 0x159   :  { %2765 = vmatpush3.msra.mxu1 %v3951_v51  ;;  %2766 = vmatprep.mubr.msk.f32.mxu1 %vm3719_vm0, %v3718_v0 }
 0x15a   :  { %2800 = vmatpush3.msra.mxu0 %v4042_v2  ;;  %2801 = vmatprep.mubr.msk.f32.mxu0 %vm3719_vm0, %v3718_v0 }
 0x15b   :  { %2804 = vmatprep.subr.mxu1 %v3718_v0  ;;  %2839 = vmatprep.subr.mxu0 %v3718_v0 }
 0x1fa   :  { %v447_v31 = vpop.f32.mrf.mxu1  ;;  %v520_v4 = vpop.f32.mrf.mxu0 }
 0x1fb   :  { %v451_v7 = vadd.f32 %v447_v31, %v362_v29  ;;  %v521_v9 = vadd.f32 %v520_v4, %v453_v32 }
 0x1fc   :  { %v2698_v11 = vpop.f32.mrf.mxu1  ;;  %v2733_v13 = vpop.f32.mrf.mxu0 }
 0x1fd   :  { %3482 = vtanh.f32 %v451_v7  ;;  %v4344_v7 = vld [vmem:[#allocation6 + $0x78] sm:$0xff]  ;;  %v4355_v13 = vld [vmem:[#allocation6 + $0x70] sm:$0xff] }
 0x1fe   :  { %3484 = vtanh.f32 %v521_v9 }
 0x20a   :  { %v4125_v15 = vpop.eup %3482 }
 0x20b   :  { %v4127_v17 = vpop.eup %3484  ;;  %2767 = vmatmul.mubr.f32.vlgmr.msra.gmra.mxu1 %v4125_v15 }
 0x20c   :  { %2802 = vmatmul.mubr.f32.vlgmr.msra.gmra.mxu0 %v4127_v17  ;;  %2805 = vmatpush3.msra.mxu1 %v3800_v3 }
 0x20d   :  { %2806 = vmatprep.subr.mxu1 %v3718_v0  ;;  %2836 = vmatprep.mubr.msk.f32.mxu1 %vm3719_vm0, %v3718_v0 }
 0x20e   :  { %2807 = vmatpush3.msra.mxu1 %v3804_v5  ;;  %2840 = vmatpush3.msra.mxu0 %v3877_v34 }
 0x20f   :  { %2808 = vmatprep.subr.mxu1 %v3718_v0  ;;  %2841 = vmatprep.subr.mxu0 %v3718_v0 }
 0x210   :  { %2809 = vmatpush3.msra.mxu1 %v3807_v6  ;;  %2842 = vmatpush3.msra.mxu0 %v3882_v35 }
 0x211   :  { %2810 = vmatprep.subr.mxu1 %v3718_v0  ;;  %2843 = vmatprep.subr.mxu0 %v3718_v0 }
 0x212   :  { %2811 = vmatpush3.msra.mxu1 %v3812_v8  ;;  %2844 = vmatpush3.msra.mxu0 %v3890_v37 }
 0x213   :  { %2812 = vmatprep.subr.mxu1 %v3718_v0  ;;  %2845 = vmatprep.subr.mxu0 %v3718_v0 }
 0x214   :  { %2813 = vmatpush3.msra.mxu1 %v3817_v10  ;;  %2846 = vmatpush3.msra.mxu0 %v3898_v39 }
 0x215   :  { %2814 = vmatprep.subr.mxu1 %v3718_v0  ;;  %2847 = vmatprep.subr.mxu0 %v3718_v0 }
 0x216   :  { %2815 = vmatpush3.msra.mxu1 %v3822_v12  ;;  %2848 = vmatpush3.msra.mxu0 %v3904_v40 }
 0x217   :  { %2816 = vmatprep.subr.mxu1 %v3718_v0  ;;  %2849 = vmatprep.subr.mxu0 %v3718_v0 }
 0x218   :  { %2817 = vmatpush3.msra.mxu1 %v3827_v14  ;;  %2850 = vmatpush3.msra.mxu0 %v3911_v41 }
 0x219   :  { %2818 = vmatprep.subr.mxu1 %v3718_v0  ;;  %2851 = vmatprep.subr.mxu0 %v3718_v0 }
 0x21a   :  { %2819 = vmatpush3.msra.mxu1 %v3832_v16  ;;  %2852 = vmatpush3.msra.mxu0 %v3915_v42 }
 0x21b   :  { %2820 = vmatprep.subr.mxu1 %v3718_v0  ;;  %2853 = vmatprep.subr.mxu0 %v3718_v0 }
 0x21c   :  { %2821 = vmatpush3.msra.mxu1 %v3837_v18  ;;  %2854 = vmatpush3.msra.mxu0 %v3919_v43 }
 0x21d   :  { %2822 = vmatprep.subr.mxu1 %v3718_v0  ;;  %2855 = vmatprep.subr.mxu0 %v3718_v0 }
 0x21e   :  { %2823 = vmatpush3.msra.mxu1 %v3842_v20  ;;  %2856 = vmatpush3.msra.mxu0 %v3923_v44 }
 0x21f   :  { %2824 = vmatprep.subr.mxu1 %v3718_v0  ;;  %2857 = vmatprep.subr.mxu0 %v3718_v0 }
 0x220   :  { %2825 = vmatpush3.msra.mxu1 %v3847_v22  ;;  %2858 = vmatpush3.msra.mxu0 %v3927_v45 }
 0x221   :  { %2826 = vmatprep.subr.mxu1 %v3718_v0  ;;  %2859 = vmatprep.subr.mxu0 %v3718_v0 }
 0x222   :  { %2827 = vmatpush3.msra.mxu1 %v3852_v24  ;;  %2860 = vmatpush3.msra.mxu0 %v3931_v46 }
 0x223   :  { %2828 = vmatprep.subr.mxu1 %v3718_v0  ;;  %2861 = vmatprep.subr.mxu0 %v3718_v0 }
 0x224   :  { %2829 = vmatpush3.msra.mxu1 %v3857_v26  ;;  %2862 = vmatpush3.msra.mxu0 %v3935_v47 }
 0x225   :  { %2830 = vmatprep.subr.mxu1 %v3718_v0  ;;  %2863 = vmatprep.subr.mxu0 %v3718_v0 }
 0x226   :  { %2831 = vmatpush3.msra.mxu1 %v3862_v28  ;;  %2864 = vmatpush3.msra.mxu0 %v3939_v48 }
 0x227   :  { %2832 = vmatprep.subr.mxu1 %v3718_v0  ;;  %2865 = vmatprep.subr.mxu0 %v3718_v0 }
 0x228   :  { %2833 = vmatpush3.msra.mxu1 %v3867_v30  ;;  %2866 = vmatpush3.msra.mxu0 %v3943_v49 }
 0x229   :  { %2834 = vmatprep.subr.mxu1 %v3718_v0  ;;  %2867 = vmatprep.subr.mxu0 %v3718_v0 }
 0x22a   :  { %2835 = vmatpush3.msra.mxu1 %v3872_v33  ;;  %2868 = vmatpush3.msra.mxu0 %v3947_v50 }
 0x22b   :  { %2837 = vmatmul.mubr.f32.vlgmr.msra.gmra.mxu1 %v4127_v17  ;;  %2869 = vmatprep.subr.mxu0 %v3718_v0  ;;  %v4361_v17 = vld [vmem:[#allocation6 + $0x68] sm:$0xff] }
 0x22c   :  { %2874 = vmatprep.subr.mxu1 %v3718_v0  ;;  %2870 = vmatpush3.msra.mxu0 %v3951_v51 }
 0x22d   :  { %2875 = vmatpush3.msra.mxu1 %v3884_v36  ;;  %2871 = vmatprep.mubr.msk.f32.mxu0 %vm3719_vm0, %v3718_v0 }
 0x22e   :  { %2876 = vmatprep.subr.mxu1 %v3718_v0  ;;  %2909 = vmatprep.subr.mxu0 %v3718_v0 }
 0x22f   :  { %2877 = vmatpush3.msra.mxu1 %v3893_v38  ;;  %2906 = vmatprep.mubr.msk.f32.mxu1 %vm3719_vm0, %v3718_v0 }
 0x230   :  { %2878 = vmatprep.subr.mxu1 %v3718_v0 }
 0x231   :  { %2879 = vmatpush3.msra.mxu1 %v3989_v52 }
 0x232   :  { %2880 = vmatprep.subr.mxu1 %v3718_v0 }
 0x233   :  { %2881 = vmatpush3.msra.mxu1 %v3995_v53 }
 0x234   :  { %2882 = vmatprep.subr.mxu1 %v3718_v0 }
 0x235   :  { %2883 = vmatpush3.msra.mxu1 %v4000_v54 }
 0x236   :  { %2884 = vmatprep.subr.mxu1 %v3718_v0 }
 0x237   :  { %2885 = vmatpush3.msra.mxu1 %v4002_v55 }
 0x238   :  { %2886 = vmatprep.subr.mxu1 %v3718_v0 }
 0x239   :  { %2887 = vmatpush3.msra.mxu1 %v4008_v56 }
 0x23a   :  { %2888 = vmatprep.subr.mxu1 %v3718_v0 }
 0x23b   :  { %2889 = vmatpush3.msra.mxu1 %v4012_v57 }
 0x23c   :  { %2890 = vmatprep.subr.mxu1 %v3718_v0 }
 0x23d   :  { %2891 = vmatpush3.msra.mxu1 %v4016_v58 }
 0x23e   :  { %2892 = vmatprep.subr.mxu1 %v3718_v0 }
 0x23f   :  { %2893 = vmatpush3.msra.mxu1 %v4020_v59 }
 0x240   :  { %2894 = vmatprep.subr.mxu1 %v3718_v0 }
 0x241   :  { %2895 = vmatpush3.msra.mxu1 %v4022_v60 }
 0x242   :  { %2896 = vmatprep.subr.mxu1 %v3718_v0 }
 0x243   :  { %2897 = vmatpush3.msra.mxu1 %v4026_v61 }
 0x244   :  { %2898 = vmatprep.subr.mxu1 %v3718_v0 }
 0x245   :  { %2899 = vmatpush3.msra.mxu1 %v4030_v62 }
 0x246   :  { %2900 = vmatprep.subr.mxu1 %v3718_v0 }
 0x247   :  { %2901 = vmatpush3.msra.mxu1 %v4034_v63 }
 0x248   :  { %2902 = vmatprep.subr.mxu1 %v3718_v0 }
 0x249   :  { %2903 = vmatpush3.msra.mxu1 %v4038_v1 }
 0x24a   :  { %2904 = vmatprep.subr.mxu1 %v3718_v0 }
 0x24b   :  { %2905 = vmatpush3.msra.mxu1 %v4042_v2 }
 0x24c   :  { %2944 = vmatprep.subr.mxu1 %v3718_v0 }
 0x2cb   :  { %v591_v19 = vpop.f32.mrf.mxu1 }
 0x2cc   :  { %v592_v21 = vadd.f32 %v591_v19, %v4122_v27  ;;  %v661_v23 = vpop.f32.mrf.mxu0  ;;  %v4535_v19 = vld [vmem:[#allocation6 + $0xe8] sm:$0xff] }
 0x2cd   :  { %v2768_v25 = vpop.f32.mrf.mxu1 }
 0x2ce   :  { %v665_v29 = vadd.f32 %v661_v23, %v592_v21  ;;  %v2803_v31 = vpop.f32.mrf.mxu0  ;;  %v4541_v21 = vld [vmem:[#allocation6 + $0xe0] sm:$0xff]  ;;  %v4546_v23 = vld [vmem:[#allocation8 + $0x68] sm:$0xff]  ;;  %v4549_v25 = vld [vmem:[#allocation6 + $0xd8] sm:$0xff] }
 0x2cf   :  { %v4557_v31 = vld [vmem:[#allocation6 + $0xd0] sm:$0xff] }
 0x2d0   :  { %3486 = vtanh.f32 %v665_v29  ;;  %v4554_v29 = vld [vmem:[#allocation8 + $0x60] sm:$0xff] }
 0x2dd   :  { %v4235_v32 = vpop.eup %3486 }
 0x2de   :  { %2872 = vmatmul.mubr.f32.vlgmr.msra.gmra.mxu0 %v4235_v32 }
 0x2df   :  { %2910 = vmatpush3.msra.mxu0 %v3800_v3  ;;  %2941 = vmatprep.mubr.msk.f32.mxu0 %vm3719_vm0, %v3718_v0  ;;  %v667_v3 = vld [vmem:[#allocation2 + $0x2] sm:$0x1] }
 0x2e0   :  { %2911 = vmatprep.subr.mxu0 %v3718_v0 }
 0x2e1   :  { %2912 = vmatpush3.msra.mxu0 %v3804_v5 }
 0x2e2   :  { %2913 = vmatprep.subr.mxu0 %v3718_v0 }
 0x2e3   :  { %2914 = vmatpush3.msra.mxu0 %v3807_v6 }
 0x2e4   :  { %2915 = vmatprep.subr.mxu0 %v3718_v0 }
 0x2e5   :  { %2916 = vmatpush3.msra.mxu0 %v3812_v8 }
 0x2e6   :  { %2917 = vmatprep.subr.mxu0 %v3718_v0 }
 0x2e7   :  { %2918 = vmatpush3.msra.mxu0 %v3817_v10 }
 0x2e8   :  { %2919 = vmatprep.subr.mxu0 %v3718_v0 }
 0x2e9   :  { %2920 = vmatpush3.msra.mxu0 %v3822_v12 }
 0x2ea   :  { %2921 = vmatprep.subr.mxu0 %v3718_v0 }
 0x2eb   :  { %v734_v5 = vpop.f32.mrf.mxu1  ;;  %2922 = vmatpush3.msra.mxu0 %v3827_v14 }
 0x2ec   :  { %v735_v4 = vadd.f32 %v734_v5, %v667_v3  ;;  %2923 = vmatprep.subr.mxu0 %v3718_v0  ;;  %v4565_v3 = vld [vmem:[#allocation6 + $0xc8] sm:$0xff]  ;;  %v4570_v5 = vld [vmem:[#allocation8 + $0x50] sm:$0xff] }
 0x2ed   :  { %v2838_v6 = vpop.f32.mrf.mxu1  ;;  %2924 = vmatpush3.msra.mxu0 %v3832_v16 }
 0x2ee   :  { %3488 = vtanh.f32 %v735_v4  ;;  %2925 = vmatprep.subr.mxu0 %v3718_v0  ;;  %v4573_v4 = vld [vmem:[#allocation6 + $0xc0] sm:$0xff]  ;;  %v4578_v6 = vld [vmem:[#allocation8 + $0x48] sm:$0xff] }
 0x2ef   :  { %2926 = vmatpush3.msra.mxu0 %v3837_v18 }
 0x2f0   :  { %2927 = vmatprep.subr.mxu0 %v3718_v0 }
 0x2f1   :  { %2928 = vmatpush3.msra.mxu0 %v3842_v20 }
 0x2f2   :  { %2929 = vmatprep.subr.mxu0 %v3718_v0 }
 0x2f3   :  { %2930 = vmatpush3.msra.mxu0 %v3847_v22  ;;  %v881_v22 = vld [vmem:[#allocation2 + $0x3] sm:$0x1] }
 0x2f4   :  { %2931 = vmatprep.subr.mxu0 %v3718_v0 }
 0x2f5   :  { %2932 = vmatpush3.msra.mxu0 %v3852_v24 }
 0x2f6   :  { %2933 = vmatprep.subr.mxu0 %v3718_v0 }
 0x2f7   :  { %2934 = vmatpush3.msra.mxu0 %v3857_v26 }
 0x2f8   :  { %2935 = vmatprep.subr.mxu0 %v3718_v0 }
 0x2f9   :  { %2936 = vmatpush3.msra.mxu0 %v3862_v28 }
 0x2fa   :  { %2937 = vmatprep.subr.mxu0 %v3718_v0 }
 0x2fb   :  { %v3489_v8 = vpop.eup %3488  ;;  %2938 = vmatpush3.msra.mxu0 %v3867_v30  ;;  %v1952_v30 = vrot.slane %v4235_v32, 7  ;;  %v4562_v32 = vld [vmem:[#allocation8 + $0x58] sm:$0xff] }
 0x2fc   :  { %2907 = vmatmul.mubr.f32.vlgmr.msra.gmra.mxu1 %v3489_v8  ;;  %2939 = vmatprep.subr.mxu0 %v3718_v0 }
 0x2fd   :  { %2940 = vmatpush3.msra.mxu0 %v3872_v33  ;;  %2945 = vmatpush3.msra.mxu1 %v3877_v34  ;;  %v1973_v9 = vsel %vm1972_vm1, %v4125_v15, %v1952_v30  ;;  %v4367_v15 = vld [vmem:[#allocation6 + $0x60] sm:$0xff]  ;;  %v4626_v30 = vld [vmem:[#allocation8 + $0x18] sm:$0xff] }
 0x2fe   :  { %2942 = vmatmul.mubr.f32.vlgmr.msra.gmra.mxu0 %v3489_v8  ;;  %2946 = vmatprep.subr.mxu1 %v3718_v0  ;;  %v4581_v8 = vld [vmem:[#allocation6 + $0xb8] sm:$0xff] }
 0x2ff   :  { %2947 = vmatpush3.msra.mxu1 %v3882_v35  ;;  %2979 = vmatprep.subr.mxu0 %v3718_v0 }
 0x300   :  { %2948 = vmatprep.subr.mxu1 %v3718_v0  ;;  %2980 = vmatpush3.msra.mxu0 %v3884_v36 }
 0x301   :  { %2949 = vmatpush3.msra.mxu1 %v3890_v37  ;;  %2981 = vmatprep.subr.mxu0 %v3718_v0 }
 0x302   :  { %2950 = vmatprep.subr.mxu1 %v3718_v0  ;;  %2982 = vmatpush3.msra.mxu0 %v3893_v38 }
 0x303   :  { %2951 = vmatpush3.msra.mxu1 %v3898_v39  ;;  %2983 = vmatprep.subr.mxu0 %v3718_v0 }
 0x304   :  { %2952 = vmatprep.subr.mxu1 %v3718_v0  ;;  %2984 = vmatpush3.msra.mxu0 %v3989_v52 }
 0x305   :  { %2953 = vmatpush3.msra.mxu1 %v3904_v40  ;;  %2985 = vmatprep.subr.mxu0 %v3718_v0 }
 0x306   :  { %2954 = vmatprep.subr.mxu1 %v3718_v0  ;;  %2986 = vmatpush3.msra.mxu0 %v3995_v53 }
 0x307   :  { %2955 = vmatpush3.msra.mxu1 %v3911_v41  ;;  %2987 = vmatprep.subr.mxu0 %v3718_v0 }
 0x308   :  { %2956 = vmatprep.subr.mxu1 %v3718_v0  ;;  %2988 = vmatpush3.msra.mxu0 %v4000_v54 }
 0x309   :  { %2957 = vmatpush3.msra.mxu1 %v3915_v42  ;;  %2989 = vmatprep.subr.mxu0 %v3718_v0 }
 0x30a   :  { %2958 = vmatprep.subr.mxu1 %v3718_v0  ;;  %2990 = vmatpush3.msra.mxu0 %v4002_v55 }
 0x30b   :  { %2959 = vmatpush3.msra.mxu1 %v3919_v43  ;;  %2991 = vmatprep.subr.mxu0 %v3718_v0 }
 0x30c   :  { %2960 = vmatprep.subr.mxu1 %v3718_v0  ;;  %2992 = vmatpush3.msra.mxu0 %v4008_v56 }
 0x30d   :  { %2961 = vmatpush3.msra.mxu1 %v3923_v44  ;;  %2993 = vmatprep.subr.mxu0 %v3718_v0 }
 0x30e   :  { %2962 = vmatprep.subr.mxu1 %v3718_v0  ;;  %2994 = vmatpush3.msra.mxu0 %v4012_v57 }
 0x30f   :  { %2963 = vmatpush3.msra.mxu1 %v3927_v45  ;;  %2995 = vmatprep.subr.mxu0 %v3718_v0 }
 0x310   :  { %2964 = vmatprep.subr.mxu1 %v3718_v0  ;;  %2996 = vmatpush3.msra.mxu0 %v4016_v58 }
 0x311   :  { %2965 = vmatpush3.msra.mxu1 %v3931_v46  ;;  %2997 = vmatprep.subr.mxu0 %v3718_v0 }
 0x312   :  { %2966 = vmatprep.subr.mxu1 %v3718_v0  ;;  %2998 = vmatpush3.msra.mxu0 %v4020_v59 }
 0x313   :  { %2967 = vmatpush3.msra.mxu1 %v3935_v47  ;;  %2999 = vmatprep.subr.mxu0 %v3718_v0 }
 0x314   :  { %2968 = vmatprep.subr.mxu1 %v3718_v0  ;;  %3000 = vmatpush3.msra.mxu0 %v4022_v60 }
 0x315   :  { %2969 = vmatpush3.msra.mxu1 %v3939_v48  ;;  %3001 = vmatprep.subr.mxu0 %v3718_v0 }
 0x316   :  { %2970 = vmatprep.subr.mxu1 %v3718_v0  ;;  %3002 = vmatpush3.msra.mxu0 %v4026_v61 }
 0x317   :  { %2971 = vmatpush3.msra.mxu1 %v3943_v49  ;;  %3003 = vmatprep.subr.mxu0 %v3718_v0 }
 0x318   :  { %2972 = vmatprep.subr.mxu1 %v3718_v0  ;;  %3004 = vmatpush3.msra.mxu0 %v4030_v62 }
 0x319   :  { %2973 = vmatpush3.msra.mxu1 %v3947_v50  ;;  %3005 = vmatprep.subr.mxu0 %v3718_v0 }
 0x31a   :  { %2974 = vmatprep.subr.mxu1 %v3718_v0  ;;  %3006 = vmatpush3.msra.mxu0 %v4034_v63 }
 0x31b   :  { %2975 = vmatpush3.msra.mxu1 %v3951_v51  ;;  %3007 = vmatprep.subr.mxu0 %v3718_v0 }
 0x31c   :  { %2976 = vmatprep.mubr.msk.f32.mxu1 %vm3719_vm0, %v3718_v0  ;;  %3008 = vmatpush3.msra.mxu0 %v4038_v1 }
 0x31d   :  { %3014 = vmatprep.subr.mxu1 %v3718_v0  ;;  %3009 = vmatprep.subr.mxu0 %v3718_v0 }
 0x31e   :  { %3010 = vmatpush3.msra.mxu0 %v4042_v2  ;;  %3011 = vmatprep.mubr.msk.f32.mxu0 %vm3719_vm0, %v3718_v0 }
 0x31f   :  { %3049 = vmatprep.subr.mxu0 %v3718_v0 }
 0x39e   :  { %v805_v10 = vpop.f32.mrf.mxu0 }
 0x39f   :  { %v806_v14 = vadd.f32 %v805_v10, %v4122_v27  ;;  %v4586_v10 = vld [vmem:[#allocation8 + $0x40] sm:$0xff] }
 0x3a0   :  { %v2873_v12 = vpop.f32.mrf.mxu0 }
 0x3a1   :  { %v4589_v12 = vld [vmem:[#allocation6 + $0xb0] sm:$0xff] }
 0x3bc   :  { %v875_v16 = vpop.f32.mrf.mxu1 }
 0x3bd   :  { %v879_v18 = vadd.f32 %v875_v16, %v806_v14  ;;  %v4594_v14 = vld [vmem:[#allocation8 + $0x38] sm:$0xff]  ;;  %v4597_v16 = vld [vmem:[#allocation6 + $0xa8] sm:$0xff] }
 0x3be   :  { %v2908_v20 = vpop.f32.mrf.mxu1  ;;  %v948_v24 = vpop.f32.mrf.mxu0 }
 0x3bf   :  { %3490 = vtanh.f32 %v879_v18  ;;  %v949_v26 = vadd.f32 %v948_v24, %v881_v22  ;;  %v4602_v18 = vld [vmem:[#allocation8 + $0x30] sm:$0xff]  ;;  %v4605_v20 = vld [vmem:[#allocation6 + $0xa0] sm:$0xff]  ;;  %v4610_v22 = vld [vmem:[#allocation8 + $0x28] sm:$0xff] }
 0x3c0   :  { %v2943_v28 = vpop.f32.mrf.mxu0  ;;  %v4613_v24 = vld [vmem:[#allocation6 + $0x98] sm:$0xff] }
 0x3c1   :  { %3492 = vtanh.f32 %v949_v26  ;;  %v4618_v26 = vld [vmem:[#allocation8 + $0x20] sm:$0xff]  ;;  %v4621_v28 = vld [vmem:[#allocation6 + $0x90] sm:$0xff] }
 0x3cc   :  { %v3491_v33 = vpop.eup %3490 }
 0x3cd   :  { %v1955_v36 = vrot.slane %v3491_v33, 6  ;;  %2977 = vmatmul.mubr.f32.vlgmr.msra.gmra.mxu1 %v3491_v33  ;;  %v4629_v33 = vld [vmem:[#allocation6 + $0x88] sm:$0xff] }
 0x3ce   :  { %v4342_v38 = vpop.eup %3492  ;;  %3015 = vmatpush3.msra.mxu1 %v4344_v7  ;;  %3046 = vmatprep.mubr.msk.f32.mxu1 %vm3719_vm0, %v3718_v0 }
 0x3cf   :  { %3016 = vmatprep.subr.mxu1 %v3718_v0  ;;  %3012 = vmatmul.mubr.f32.vlgmr.msra.gmra.mxu0 %v4342_v38  ;;  %v4353_v11 = vsel %vm1974_vm2, %v1973_v9, %v1955_v36  ;;  %v4634_v36 = vld [vmem:[#allocation8 + $0x10] sm:$0xff]  ;;  %v4643_v9 = vld [vmem:[#allocation8 + $0x8] sm:$0xff] }
 0x3d0   :  { %3017 = vmatpush3.msra.mxu1 %v4355_v13  ;;  %3050 = vmatpush3.msra.mxu0 %v3877_v34  ;;  %v4373_v34 = vld [vmem:[#allocation6 + $0x58] sm:$0xff] }
 0x3d1   :  { %3018 = vmatprep.subr.mxu1 %v3718_v0  ;;  %3051 = vmatprep.subr.mxu0 %v3718_v0 }
 0x3d2   :  { %3019 = vmatpush3.msra.mxu1 %v4361_v17  ;;  %3052 = vmatpush3.msra.mxu0 %v3882_v35  ;;  %v4379_v35 = vld [vmem:[#allocation6 + $0x50] sm:$0xff] }
 0x3d3   :  { %3020 = vmatprep.subr.mxu1 %v3718_v0  ;;  %3053 = vmatprep.subr.mxu0 %v3718_v0 }
 0x3d4   :  { %3021 = vmatpush3.msra.mxu1 %v4367_v15  ;;  %3054 = vmatpush3.msra.mxu0 %v3890_v37  ;;  %v4385_v37 = vld [vmem:[#allocation6 + $0x48] sm:$0xff] }
 0x3d5   :  { %3022 = vmatprep.subr.mxu1 %v3718_v0  ;;  %3055 = vmatprep.subr.mxu0 %v3718_v0 }
 0x3d6   :  { %3023 = vmatpush3.msra.mxu1 %v4373_v34  ;;  %3056 = vmatpush3.msra.mxu0 %v3898_v39  ;;  %v4391_v39 = vld [vmem:[#allocation6 + $0x40] sm:$0xff] }
 0x3d7   :  { %3024 = vmatprep.subr.mxu1 %v3718_v0  ;;  %3057 = vmatprep.subr.mxu0 %v3718_v0 }
 0x3d8   :  { %3025 = vmatpush3.msra.mxu1 %v4379_v35  ;;  %3058 = vmatpush3.msra.mxu0 %v3904_v40  ;;  %v4397_v40 = vld [vmem:[#allocation6 + $0x38] sm:$0xff] }
 0x3d9   :  { %3026 = vmatprep.subr.mxu1 %v3718_v0  ;;  %3059 = vmatprep.subr.mxu0 %v3718_v0 }
 0x3da   :  { %3027 = vmatpush3.msra.mxu1 %v4385_v37  ;;  %3060 = vmatpush3.msra.mxu0 %v3911_v41  ;;  %v4403_v41 = vld [vmem:[#allocation6 + $0x30] sm:$0xff] }
 0x3db   :  { %3028 = vmatprep.subr.mxu1 %v3718_v0  ;;  %3061 = vmatprep.subr.mxu0 %v3718_v0 }
 0x3dc   :  { %3029 = vmatpush3.msra.mxu1 %v4391_v39  ;;  %3062 = vmatpush3.msra.mxu0 %v3915_v42  ;;  %v4409_v42 = vld [vmem:[#allocation6 + $0x28] sm:$0xff] }
 0x3dd   :  { %3030 = vmatprep.subr.mxu1 %v3718_v0  ;;  %3063 = vmatprep.subr.mxu0 %v3718_v0 }
 0x3de   :  { %3031 = vmatpush3.msra.mxu1 %v4397_v40  ;;  %3064 = vmatpush3.msra.mxu0 %v3919_v43  ;;  %v4415_v43 = vld [vmem:[#allocation6 + $0x20] sm:$0xff] }
 0x3df   :  { %3032 = vmatprep.subr.mxu1 %v3718_v0  ;;  %3065 = vmatprep.subr.mxu0 %v3718_v0 }
 0x3e0   :  { %3033 = vmatpush3.msra.mxu1 %v4403_v41  ;;  %3066 = vmatpush3.msra.mxu0 %v3923_v44  ;;  %v4421_v44 = vld [vmem:[#allocation6 + $0x18] sm:$0xff] }
 0x3e1   :  { %3034 = vmatprep.subr.mxu1 %v3718_v0  ;;  %3067 = vmatprep.subr.mxu0 %v3718_v0 }
 0x3e2   :  { %3035 = vmatpush3.msra.mxu1 %v4409_v42  ;;  %3068 = vmatpush3.msra.mxu0 %v3927_v45  ;;  %v4427_v45 = vld [vmem:[#allocation6 + $0x10] sm:$0xff] }
 0x3e3   :  { %3036 = vmatprep.subr.mxu1 %v3718_v0  ;;  %3069 = vmatprep.subr.mxu0 %v3718_v0 }
 0x3e4   :  { %3037 = vmatpush3.msra.mxu1 %v4415_v43  ;;  %3070 = vmatpush3.msra.mxu0 %v3931_v46  ;;  %v4433_v46 = vld [vmem:[#allocation6 + $0x8] sm:$0xff] }
 0x3e5   :  { %3038 = vmatprep.subr.mxu1 %v3718_v0  ;;  %3071 = vmatprep.subr.mxu0 %v3718_v0 }
 0x3e6   :  { %3039 = vmatpush3.msra.mxu1 %v4421_v44  ;;  %3072 = vmatpush3.msra.mxu0 %v3935_v47  ;;  %v4439_v47 = vld [vmem:[#allocation6] sm:$0xff] }
 0x3e7   :  { %3040 = vmatprep.subr.mxu1 %v3718_v0  ;;  %3073 = vmatprep.subr.mxu0 %v3718_v0 }
 0x3e8   :  { %3041 = vmatpush3.msra.mxu1 %v4427_v45  ;;  %3074 = vmatpush3.msra.mxu0 %v3939_v48  ;;  %v4447_v48 = vld [vmem:[#allocation8 + $0x78] sm:$0xff] }
 0x3e9   :  { %3042 = vmatprep.subr.mxu1 %v3718_v0  ;;  %3075 = vmatprep.subr.mxu0 %v3718_v0 }
 0x3ea   :  { %3043 = vmatpush3.msra.mxu1 %v4433_v46  ;;  %3076 = vmatpush3.msra.mxu0 %v3943_v49  ;;  %v4454_v49 = vld [vmem:[#allocation8 + $0x70] sm:$0xff] }
 0x3eb   :  { %3044 = vmatprep.subr.mxu1 %v3718_v0  ;;  %3077 = vmatprep.subr.mxu0 %v3718_v0 }
 0x3ec   :  { %3045 = vmatpush3.msra.mxu1 %v4439_v47  ;;  %3078 = vmatpush3.msra.mxu0 %v3947_v50 }
 0x3ed   :  { %3047 = vmatmul.mubr.f32.vlgmr.msra.gmra.mxu1 %v4342_v38  ;;  %3079 = vmatprep.subr.mxu0 %v3718_v0  ;;  %v4637_v38 = vld [vmem:[#allocation6 + $0x80] sm:$0xff] }
 0x3ee   :  { %3084 = vmatprep.subr.mxu1 %v3718_v0  ;;  %3080 = vmatpush3.msra.mxu0 %v3951_v51 }
 0x3ef   :  { %3085 = vmatpush3.msra.mxu1 %v4447_v48  ;;  %3081 = vmatprep.mubr.msk.f32.mxu0 %vm3719_vm0, %v3718_v0 }
 0x3f0   :  { %3086 = vmatprep.subr.mxu1 %v3718_v0  ;;  %3119 = vmatprep.subr.mxu0 %v3718_v0 }
 0x3f1   :  { %3087 = vmatpush3.msra.mxu1 %v4454_v49  ;;  %3116 = vmatprep.mubr.msk.f32.mxu1 %vm3719_vm0, %v3718_v0 }
 0x3f2   :  { %3088 = vmatprep.subr.mxu1 %v3718_v0 }
 0x3f3   :  { %3089 = vmatpush3.msra.mxu1 %v3989_v52 }
 0x3f4   :  { %3090 = vmatprep.subr.mxu1 %v3718_v0 }
 0x3f5   :  { %3091 = vmatpush3.msra.mxu1 %v3995_v53 }
 0x3f6   :  { %3092 = vmatprep.subr.mxu1 %v3718_v0 }
 0x3f7   :  { %3093 = vmatpush3.msra.mxu1 %v4000_v54 }
 0x3f8   :  { %3094 = vmatprep.subr.mxu1 %v3718_v0 }
 0x3f9   :  { %3095 = vmatpush3.msra.mxu1 %v4002_v55 }
 0x3fa   :  { %3096 = vmatprep.subr.mxu1 %v3718_v0 }
 0x3fb   :  { %3097 = vmatpush3.msra.mxu1 %v4008_v56 }
 0x3fc   :  { %3098 = vmatprep.subr.mxu1 %v3718_v0 }
 0x3fd   :  { %3099 = vmatpush3.msra.mxu1 %v4012_v57 }
 0x3fe   :  { %3100 = vmatprep.subr.mxu1 %v3718_v0 }
 0x3ff   :  { %3101 = vmatpush3.msra.mxu1 %v4016_v58 }
 0x400   :  { %3102 = vmatprep.subr.mxu1 %v3718_v0 }
 0x401   :  { %3103 = vmatpush3.msra.mxu1 %v4020_v59  ;;  %v1095_v59 = vld [vmem:[#allocation2 + $0x4] sm:$0x1] }
 0x402   :  { %3104 = vmatprep.subr.mxu1 %v3718_v0 }
 0x403   :  { %3105 = vmatpush3.msra.mxu1 %v4022_v60 }
 0x404   :  { %3106 = vmatprep.subr.mxu1 %v3718_v0 }
 0x405   :  { %3107 = vmatpush3.msra.mxu1 %v4026_v61 }
 0x406   :  { %3108 = vmatprep.subr.mxu1 %v3718_v0 }
 0x407   :  { %3109 = vmatpush3.msra.mxu1 %v4030_v62 }
 0x408   :  { %3110 = vmatprep.subr.mxu1 %v3718_v0 }
 0x409   :  { %3111 = vmatpush3.msra.mxu1 %v4034_v63 }
 0x40a   :  { %3112 = vmatprep.subr.mxu1 %v3718_v0 }
 0x40b   :  { %3113 = vmatpush3.msra.mxu1 %v4038_v1  ;;  %v4525_v1 = vld [vmem:[#allocation6 + $0xf8] sm:$0xff] }
 0x40c   :  { %3114 = vmatprep.subr.mxu1 %v3718_v0 }
 0x40d   :  { %3115 = vmatpush3.msra.mxu1 %v4042_v2  ;;  %v4529_v2 = vld [vmem:[#allocation6 + $0xf0] sm:$0xff] }
 0x40e   :  { %3154 = vmatprep.subr.mxu1 %v3718_v0 }
 0x48d   :  { %v1019_v50 = vpop.f32.mrf.mxu1 }
 0x48e   :  { %v1020_v51 = vadd.f32 %v1019_v50, %v4122_v27 }
 0x48f   :  { %v2978_v52 = vpop.f32.mrf.mxu1  ;;  %v1089_v53 = vpop.f32.mrf.mxu0 }
 0x490   :  { %v1093_v54 = vadd.f32 %v1089_v53, %v1020_v51 }
 0x491   :  { %v3013_v55 = vpop.f32.mrf.mxu0 }
 0x492   :  { %3494 = vtanh.f32 %v1093_v54 }
 0x49f   :  { %v3495_v56 = vpop.eup %3494 }
 0x4a0   :  { %v1958_v57 = vrot.slane %v3495_v56, 5  ;;  %3082 = vmatmul.mubr.f32.vlgmr.msra.gmra.mxu0 %v3495_v56  ;;  %v1309_v56 = vld [vmem:[#allocation2 + $0x5] sm:$0x1] }
 0x4a1   :  { %3120 = vmatpush3.msra.mxu0 %v4344_v7  ;;  %3151 = vmatprep.mubr.msk.f32.mxu0 %vm3719_vm0, %v3718_v0 }
 0x4a2   :  { %3121 = vmatprep.subr.mxu0 %v3718_v0  ;;  %v4494_v58 = vsel %vm1976_vm3, %v4353_v11, %v1958_v57  ;;  %v4648_v11 = vld [vmem:[#allocation8] sm:$0xff] }
 0x4a3   :  { %3122 = vmatpush3.msra.mxu0 %v4355_v13 }
 0x4a4   :  { %3123 = vmatprep.subr.mxu0 %v3718_v0 }
 0x4a5   :  { %3124 = vmatpush3.msra.mxu0 %v4361_v17 }
 0x4a6   :  { %3125 = vmatprep.subr.mxu0 %v3718_v0 }
 0x4a7   :  { %3126 = vmatpush3.msra.mxu0 %v4367_v15 }
 0x4a8   :  { %3127 = vmatprep.subr.mxu0 %v3718_v0 }
 0x4a9   :  { %3128 = vmatpush3.msra.mxu0 %v4373_v34 }
 0x4aa   :  { %3129 = vmatprep.subr.mxu0 %v3718_v0 }
 0x4ab   :  { %3130 = vmatpush3.msra.mxu0 %v4379_v35 }
 0x4ac   :  { %3131 = vmatprep.subr.mxu0 %v3718_v0 }
 0x4ad   :  { %v1162_v60 = vpop.f32.mrf.mxu1  ;;  %3132 = vmatpush3.msra.mxu0 %v4385_v37 }
 0x4ae   :  { %v1163_v61 = vadd.f32 %v1162_v60, %v1095_v59  ;;  %3133 = vmatprep.subr.mxu0 %v3718_v0 }
 0x4af   :  { %v3048_v62 = vpop.f32.mrf.mxu1  ;;  %3134 = vmatpush3.msra.mxu0 %v4391_v39 }
 0x4b0   :  { %3496 = vtanh.f32 %v1163_v61  ;;  %3135 = vmatprep.subr.mxu0 %v3718_v0 }
 0x4b1   :  { %3136 = vmatpush3.msra.mxu0 %v4397_v40 }
 0x4b2   :  { %3137 = vmatprep.subr.mxu0 %v3718_v0 }
 0x4b3   :  { %3138 = vmatpush3.msra.mxu0 %v4403_v41 }
 0x4b4   :  { %3139 = vmatprep.subr.mxu0 %v3718_v0 }
 0x4b5   :  { %3140 = vmatpush3.msra.mxu0 %v4409_v42 }
 0x4b6   :  { %3141 = vmatprep.subr.mxu0 %v3718_v0 }
 0x4b7   :  { %3142 = vmatpush3.msra.mxu0 %v4415_v43 }
 0x4b8   :  { %3143 = vmatprep.subr.mxu0 %v3718_v0 }
 0x4b9   :  { %3144 = vmatpush3.msra.mxu0 %v4421_v44 }
 0x4ba   :  { %3145 = vmatprep.subr.mxu0 %v3718_v0 }
 0x4bb   :  { %3146 = vmatpush3.msra.mxu0 %v4427_v45 }
 0x4bc   :  { %3147 = vmatprep.subr.mxu0 %v3718_v0 }
 0x4bd   :  { %v3497_v63 = vpop.eup %3496  ;;  %3148 = vmatpush3.msra.mxu0 %v4433_v46 }
 0x4be   :  { %3117 = vmatmul.mubr.f32.vlgmr.msra.gmra.mxu1 %v3497_v63  ;;  %3149 = vmatprep.subr.mxu0 %v3718_v0 }
 0x4bf   :  { %3150 = vmatpush3.msra.mxu0 %v4439_v47  ;;  %3155 = vmatpush3.msra.mxu1 %v4525_v1 }
 0x4c0   :  { %3152 = vmatmul.mubr.f32.vlgmr.msra.gmra.mxu0 %v3497_v63  ;;  %3156 = vmatprep.subr.mxu1 %v3718_v0 }
 0x4c1   :  { %3157 = vmatpush3.msra.mxu1 %v4529_v2  ;;  %3189 = vmatprep.subr.mxu0 %v3718_v0 }
 0x4c2   :  { %3158 = vmatprep.subr.mxu1 %v3718_v0  ;;  %3190 = vmatpush3.msra.mxu0 %v4447_v48 }
 0x4c3   :  { %3159 = vmatpush3.msra.mxu1 %v4535_v19  ;;  %3191 = vmatprep.subr.mxu0 %v3718_v0 }
 0x4c4   :  { %3160 = vmatprep.subr.mxu1 %v3718_v0  ;;  %3192 = vmatpush3.msra.mxu0 %v4454_v49 }
 0x4c5   :  { %3161 = vmatpush3.msra.mxu1 %v4541_v21  ;;  %3193 = vmatprep.subr.mxu0 %v3718_v0 }
 0x4c6   :  { %3162 = vmatprep.subr.mxu1 %v3718_v0  ;;  %3194 = vmatpush3.msra.mxu0 %v4546_v23 }
 0x4c7   :  { %3163 = vmatpush3.msra.mxu1 %v4549_v25  ;;  %3195 = vmatprep.subr.mxu0 %v3718_v0 }
 0x4c8   :  { %3164 = vmatprep.subr.mxu1 %v3718_v0  ;;  %3196 = vmatpush3.msra.mxu0 %v4554_v29 }
 0x4c9   :  { %3165 = vmatpush3.msra.mxu1 %v4557_v31  ;;  %3197 = vmatprep.subr.mxu0 %v3718_v0 }
 0x4ca   :  { %3166 = vmatprep.subr.mxu1 %v3718_v0  ;;  %3198 = vmatpush3.msra.mxu0 %v4562_v32 }
 0x4cb   :  { %3167 = vmatpush3.msra.mxu1 %v4565_v3  ;;  %3199 = vmatprep.subr.mxu0 %v3718_v0 }
 0x4cc   :  { %3168 = vmatprep.subr.mxu1 %v3718_v0  ;;  %3200 = vmatpush3.msra.mxu0 %v4570_v5 }
 0x4cd   :  { %3169 = vmatpush3.msra.mxu1 %v4573_v4  ;;  %3201 = vmatprep.subr.mxu0 %v3718_v0 }
 0x4ce   :  { %3170 = vmatprep.subr.mxu1 %v3718_v0  ;;  %3202 = vmatpush3.msra.mxu0 %v4578_v6 }
 0x4cf   :  { %3171 = vmatpush3.msra.mxu1 %v4581_v8  ;;  %3203 = vmatprep.subr.mxu0 %v3718_v0 }
 0x4d0   :  { %3172 = vmatprep.subr.mxu1 %v3718_v0  ;;  %3204 = vmatpush3.msra.mxu0 %v4586_v10 }
 0x4d1   :  { %3173 = vmatpush3.msra.mxu1 %v4589_v12  ;;  %3205 = vmatprep.subr.mxu0 %v3718_v0 }
 0x4d2   :  { %3174 = vmatprep.subr.mxu1 %v3718_v0  ;;  %3206 = vmatpush3.msra.mxu0 %v4594_v14 }
 0x4d3   :  { %3175 = vmatpush3.msra.mxu1 %v4597_v16  ;;  %3207 = vmatprep.subr.mxu0 %v3718_v0 }
 0x4d4   :  { %3176 = vmatprep.subr.mxu1 %v3718_v0  ;;  %3208 = vmatpush3.msra.mxu0 %v4602_v18 }
 0x4d5   :  { %3177 = vmatpush3.msra.mxu1 %v4605_v20  ;;  %3209 = vmatprep.subr.mxu0 %v3718_v0 }
 0x4d6   :  { %3178 = vmatprep.subr.mxu1 %v3718_v0  ;;  %3210 = vmatpush3.msra.mxu0 %v4610_v22 }
 0x4d7   :  { %3179 = vmatpush3.msra.mxu1 %v4613_v24  ;;  %3211 = vmatprep.subr.mxu0 %v3718_v0 }
 0x4d8   :  { %3180 = vmatprep.subr.mxu1 %v3718_v0  ;;  %3212 = vmatpush3.msra.mxu0 %v4618_v26 }
 0x4d9   :  { %3181 = vmatpush3.msra.mxu1 %v4621_v28  ;;  %3213 = vmatprep.subr.mxu0 %v3718_v0 }
 0x4da   :  { %3182 = vmatprep.subr.mxu1 %v3718_v0  ;;  %3214 = vmatpush3.msra.mxu0 %v4626_v30 }
 0x4db   :  { %3183 = vmatpush3.msra.mxu1 %v4629_v33  ;;  %3215 = vmatprep.subr.mxu0 %v3718_v0 }
 0x4dc   :  { %3184 = vmatprep.subr.mxu1 %v3718_v0  ;;  %3216 = vmatpush3.msra.mxu0 %v4634_v36 }
 0x4dd   :  { %3185 = vmatpush3.msra.mxu1 %v4637_v38  ;;  %3217 = vmatprep.subr.mxu0 %v3718_v0 }
 0x4de   :  { %3186 = vmatprep.mubr.msk.f32.mxu1 %vm3719_vm0, %v3718_v0  ;;  %3218 = vmatpush3.msra.mxu0 %v4643_v9 }
 0x4df   :  { %3224 = vmatprep.subr.mxu1 %v3718_v0  ;;  %3219 = vmatprep.subr.mxu0 %v3718_v0 }
 0x4e0   :  { %3220 = vmatpush3.msra.mxu0 %v4648_v11  ;;  %3221 = vmatprep.mubr.msk.f32.mxu0 %vm3719_vm0, %v3718_v0 }
 0x4e1   :  { %3259 = vmatprep.subr.mxu0 %v3718_v0 }
 0x560   :  { %v1233_v50 = vpop.f32.mrf.mxu0 }
 0x561   :  { %v1234_v52 = vadd.f32 %v1233_v50, %v4122_v27  ;;  %v4767_v50 = vld [vmem:[%s4909_s5 + $0x1] sm:$0x1]  ;;  %s3720_s5 = smov [#allocation13]  }
 0x562   :  { %v3083_v51 = vpop.f32.mrf.mxu0  ;;  %s2100_s11 = sshll.u32 %s3720_s5, 4  ;;  %s2101_s11 = int_to_ptr.vmem [resolvable:$true] %s2100_s11 }
 0x563   :  { %s3661_s12 = scalar_lea.vmem %s2101_s11, 32  ;;  %p3666_p12 = scmp.lt.s32.totalorder %s2101_s11, %s2101_s11 }
 0x564   :  { %p3662_p11 = scmp.ne.s32.totalorder %s2101_s11, %s3661_s12  ;;  %p3667_p13 = scmp.lt.s32.totalorder %s3661_s12, %s3661_s12 }
 0x566   :  { %p3668_p0 = por %p3667_p13, %p3666_p12 }
 0x568   :  { %p3669_p1 = pnand %p3668_p0, %p3662_p11 }
 0x57e   :  { %v1303_v53 = vpop.f32.mrf.mxu1 }
 0x57f   :  { %v1307_v54 = vadd.f32 %v1303_v53, %v1234_v52 }
 0x580   :  { %v3118_v55 = vpop.f32.mrf.mxu1  ;;  %v1376_v57 = vpop.f32.mrf.mxu0 }
 0x581   :  { %3498 = vtanh.f32 %v1307_v54  ;;  %v1377_v59 = vadd.f32 %v1376_v57, %v1309_v56 }
 0x582   :  { %v3153_v60 = vpop.f32.mrf.mxu0 }
 0x583   :  { %3500 = vtanh.f32 %v1377_v59 }
 0x58e   :  { %v3499_v61 = vpop.eup %3498 }
 0x58f   :  { %3187 = vmatmul.mubr.f32.vlgmr.msra.gmra.mxu1 %v3499_v61  ;;  %v1961_v62 = vrot.slane %v3499_v61, 4 }
 0x590   :  { %v4655_v63 = vpop.eup %3500  ;;  %3225 = vmatpush3.msra.mxu1 %v4344_v7  ;;  %3256 = vmatprep.mubr.msk.f32.mxu1 %vm3719_vm0, %v3718_v0 }
 0x591   :  { %3226 = vmatprep.subr.mxu1 %v3718_v0  ;;  %3222 = vmatmul.mubr.f32.vlgmr.msra.gmra.mxu0 %v4655_v63  ;;  %v4663_v27 = vsel %vm1978_vm4, %v4494_v58, %v1961_v62 }
 0x592   :  { %3227 = vmatpush3.msra.mxu1 %v4355_v13  ;;  %3260 = vmatpush3.msra.mxu0 %v4525_v1 }
 0x593   :  { %3228 = vmatprep.subr.mxu1 %v3718_v0  ;;  %3261 = vmatprep.subr.mxu0 %v3718_v0 }
 0x594   :  { %3229 = vmatpush3.msra.mxu1 %v4361_v17  ;;  %3262 = vmatpush3.msra.mxu0 %v4529_v2 }
 0x595   :  { %3230 = vmatprep.subr.mxu1 %v3718_v0  ;;  %3263 = vmatprep.subr.mxu0 %v3718_v0 }
 0x596   :  { %3231 = vmatpush3.msra.mxu1 %v4367_v15  ;;  %3264 = vmatpush3.msra.mxu0 %v4535_v19 }
 0x597   :  { %3232 = vmatprep.subr.mxu1 %v3718_v0  ;;  %3265 = vmatprep.subr.mxu0 %v3718_v0 }
 0x598   :  { %3233 = vmatpush3.msra.mxu1 %v4373_v34  ;;  %3266 = vmatpush3.msra.mxu0 %v4541_v21 }
 0x599   :  { %3234 = vmatprep.subr.mxu1 %v3718_v0  ;;  %3267 = vmatprep.subr.mxu0 %v3718_v0 }
 0x59a   :  { %3235 = vmatpush3.msra.mxu1 %v4379_v35  ;;  %3268 = vmatpush3.msra.mxu0 %v4549_v25 }
 0x59b   :  { %3236 = vmatprep.subr.mxu1 %v3718_v0  ;;  %3269 = vmatprep.subr.mxu0 %v3718_v0 }
 0x59c   :  { %3237 = vmatpush3.msra.mxu1 %v4385_v37  ;;  %3270 = vmatpush3.msra.mxu0 %v4557_v31 }
 0x59d   :  { %3238 = vmatprep.subr.mxu1 %v3718_v0  ;;  %3271 = vmatprep.subr.mxu0 %v3718_v0 }
 0x59e   :  { %3239 = vmatpush3.msra.mxu1 %v4391_v39  ;;  %3272 = vmatpush3.msra.mxu0 %v4565_v3 }
 0x59f   :  { %3240 = vmatprep.subr.mxu1 %v3718_v0  ;;  %3273 = vmatprep.subr.mxu0 %v3718_v0 }
 0x5a0   :  { %3241 = vmatpush3.msra.mxu1 %v4397_v40  ;;  %3274 = vmatpush3.msra.mxu0 %v4573_v4 }
 0x5a1   :  { %3242 = vmatprep.subr.mxu1 %v3718_v0  ;;  %3275 = vmatprep.subr.mxu0 %v3718_v0 }
 0x5a2   :  { %3243 = vmatpush3.msra.mxu1 %v4403_v41  ;;  %3276 = vmatpush3.msra.mxu0 %v4581_v8 }
 0x5a3   :  { %3244 = vmatprep.subr.mxu1 %v3718_v0  ;;  %3277 = vmatprep.subr.mxu0 %v3718_v0 }
 0x5a4   :  { %3245 = vmatpush3.msra.mxu1 %v4409_v42  ;;  %3278 = vmatpush3.msra.mxu0 %v4589_v12 }
 0x5a5   :  { %3246 = vmatprep.subr.mxu1 %v3718_v0  ;;  %3279 = vmatprep.subr.mxu0 %v3718_v0 }
 0x5a6   :  { %3247 = vmatpush3.msra.mxu1 %v4415_v43  ;;  %3280 = vmatpush3.msra.mxu0 %v4597_v16 }
 0x5a7   :  { %3248 = vmatprep.subr.mxu1 %v3718_v0  ;;  %3281 = vmatprep.subr.mxu0 %v3718_v0 }
 0x5a8   :  { %3249 = vmatpush3.msra.mxu1 %v4421_v44  ;;  %3282 = vmatpush3.msra.mxu0 %v4605_v20 }
 0x5a9   :  { %3250 = vmatprep.subr.mxu1 %v3718_v0  ;;  %3283 = vmatprep.subr.mxu0 %v3718_v0 }
 0x5aa   :  { %3251 = vmatpush3.msra.mxu1 %v4427_v45  ;;  %3284 = vmatpush3.msra.mxu0 %v4613_v24 }
 0x5ab   :  { %3252 = vmatprep.subr.mxu1 %v3718_v0  ;;  %3285 = vmatprep.subr.mxu0 %v3718_v0 }
 0x5ac   :  { %3253 = vmatpush3.msra.mxu1 %v4433_v46  ;;  %3286 = vmatpush3.msra.mxu0 %v4621_v28 }
 0x5ad   :  { %3254 = vmatprep.subr.mxu1 %v3718_v0  ;;  %3287 = vmatprep.subr.mxu0 %v3718_v0 }
 0x5ae   :  { %3255 = vmatpush3.msra.mxu1 %v4439_v47  ;;  %3288 = vmatpush3.msra.mxu0 %v4629_v33 }
 0x5af   :  { %3257 = vmatmul.mubr.f32.vlgmr.msra.gmra.mxu1 %v4655_v63  ;;  %3289 = vmatprep.subr.mxu0 %v3718_v0 }
 0x5b0   :  { %3294 = vmatprep.subr.mxu1 %v3718_v0  ;;  %3290 = vmatpush3.msra.mxu0 %v4637_v38 }
 0x5b1   :  { %3295 = vmatpush3.msra.mxu1 %v4447_v48  ;;  %3291 = vmatprep.mubr.msk.f32.mxu0 %vm3719_vm0, %v3718_v0 }
 0x5b2   :  { %3296 = vmatprep.subr.mxu1 %v3718_v0  ;;  %3329 = vmatprep.subr.mxu0 %v3718_v0 }
 0x5b3   :  { %3297 = vmatpush3.msra.mxu1 %v4454_v49  ;;  %3326 = vmatprep.mubr.msk.f32.mxu1 %vm3719_vm0, %v3718_v0 }
 0x5b4   :  { %3298 = vmatprep.subr.mxu1 %v3718_v0 }
 0x5b5   :  { %3299 = vmatpush3.msra.mxu1 %v4546_v23 }
 0x5b6   :  { %3300 = vmatprep.subr.mxu1 %v3718_v0 }
 0x5b7   :  { %3301 = vmatpush3.msra.mxu1 %v4554_v29 }
 0x5b8   :  { %3302 = vmatprep.subr.mxu1 %v3718_v0 }
 0x5b9   :  { %3303 = vmatpush3.msra.mxu1 %v4562_v32 }
 0x5ba   :  { %3304 = vmatprep.subr.mxu1 %v3718_v0 }
 0x5bb   :  { %3305 = vmatpush3.msra.mxu1 %v4570_v5 }
 0x5bc   :  { %3306 = vmatprep.subr.mxu1 %v3718_v0 }
 0x5bd   :  { %3307 = vmatpush3.msra.mxu1 %v4578_v6 }
 0x5be   :  { %3308 = vmatprep.subr.mxu1 %v3718_v0 }
 0x5bf   :  { %3309 = vmatpush3.msra.mxu1 %v4586_v10 }
 0x5c0   :  { %3310 = vmatprep.subr.mxu1 %v3718_v0 }
 0x5c1   :  { %3311 = vmatpush3.msra.mxu1 %v4594_v14 }
 0x5c2   :  { %3312 = vmatprep.subr.mxu1 %v3718_v0 }
 0x5c3   :  { %3313 = vmatpush3.msra.mxu1 %v4602_v18 }
 0x5c4   :  { %3314 = vmatprep.subr.mxu1 %v3718_v0 }
 0x5c5   :  { %3315 = vmatpush3.msra.mxu1 %v4610_v22 }
 0x5c6   :  { %3316 = vmatprep.subr.mxu1 %v3718_v0 }
 0x5c7   :  { %3317 = vmatpush3.msra.mxu1 %v4618_v26 }
 0x5c8   :  { %3318 = vmatprep.subr.mxu1 %v3718_v0 }
 0x5c9   :  { %3319 = vmatpush3.msra.mxu1 %v4626_v30 }
 0x5ca   :  { %3320 = vmatprep.subr.mxu1 %v3718_v0 }
 0x5cb   :  { %3321 = vmatpush3.msra.mxu1 %v4634_v36 }
 0x5cc   :  { %3322 = vmatprep.subr.mxu1 %v3718_v0 }
 0x5cd   :  { %3323 = vmatpush3.msra.mxu1 %v4643_v9 }
 0x5ce   :  { %3324 = vmatprep.subr.mxu1 %v3718_v0 }
 0x5cf   :  { %3325 = vmatpush3.msra.mxu1 %v4648_v11 }
 0x5d0   :  { %3364 = vmatprep.subr.mxu1 %v3718_v0 }
 0x64f   :  { %v1447_v58 = vpop.f32.mrf.mxu1 }
 0x650   :  { %v1448_v51 = vadd.f32 %v4767_v50, %v1447_v58 }
 0x651   :  { %v3188_v52 = vpop.f32.mrf.mxu1  ;;  %v1517_v53 = vpop.f32.mrf.mxu0 }
 0x652   :  { %v1521_v54 = vadd.f32 %v1517_v53, %v1448_v51 }
 0x653   :  { %v3223_v55 = vpop.f32.mrf.mxu0 }
 0x654   :  { %3502 = vtanh.f32 %v1521_v54 }
 0x661   :  { %v3503_v56 = vpop.eup %3502 }
 0x662   :  { %3292 = vmatmul.mubr.f32.vlgmr.msra.gmra.mxu0 %v3503_v56  ;;  %v1964_v57 = vrot.slane %v3503_v56, 3 }
 0x663   :  { %3330 = vmatpush3.msra.mxu0 %v4344_v7  ;;  %3361 = vmatprep.mubr.msk.f32.mxu0 %vm3719_vm0, %v3718_v0  ;;  %v1523_v7 = vld [vmem:[#allocation2 + $0x6] sm:$0x1] }
 0x664   :  { %3331 = vmatprep.subr.mxu0 %v3718_v0  ;;  %v4775_v59 = vsel %vm1980_vm5, %v4663_v27, %v1964_v57 }
 0x665   :  { %3332 = vmatpush3.msra.mxu0 %v4355_v13 }
 0x666   :  { %3333 = vmatprep.subr.mxu0 %v3718_v0 }
 0x667   :  { %3334 = vmatpush3.msra.mxu0 %v4361_v17 }
 0x668   :  { %3335 = vmatprep.subr.mxu0 %v3718_v0 }
 0x669   :  { %3336 = vmatpush3.msra.mxu0 %v4367_v15 }
 0x66a   :  { %3337 = vmatprep.subr.mxu0 %v3718_v0 }
 0x66b   :  { %3338 = vmatpush3.msra.mxu0 %v4373_v34 }
 0x66c   :  { %3339 = vmatprep.subr.mxu0 %v3718_v0 }
 0x66d   :  { %3340 = vmatpush3.msra.mxu0 %v4379_v35 }
 0x66e   :  { %3341 = vmatprep.subr.mxu0 %v3718_v0 }
 0x66f   :  { %v1590_v13 = vpop.f32.mrf.mxu1  ;;  %3342 = vmatpush3.msra.mxu0 %v4385_v37 }
 0x670   :  { %v1591_v60 = vadd.f32 %v1590_v13, %v1523_v7  ;;  %3343 = vmatprep.subr.mxu0 %v3718_v0 }
 0x671   :  { %v3258_v17 = vpop.f32.mrf.mxu1  ;;  %3344 = vmatpush3.msra.mxu0 %v4391_v39 }
 0x672   :  { %3504 = vtanh.f32 %v1591_v60  ;;  %3345 = vmatprep.subr.mxu0 %v3718_v0 }
 0x673   :  { %3346 = vmatpush3.msra.mxu0 %v4397_v40 }
 0x674   :  { %3347 = vmatprep.subr.mxu0 %v3718_v0 }
 0x675   :  { %3348 = vmatpush3.msra.mxu0 %v4403_v41 }
 0x676   :  { %3349 = vmatprep.subr.mxu0 %v3718_v0 }
 0x677   :  { %3350 = vmatpush3.msra.mxu0 %v4409_v42  ;;  %v1737_v42 = vld [vmem:[#allocation2 + $0x7] sm:$0x1] }
 0x678   :  { %3351 = vmatprep.subr.mxu0 %v3718_v0 }
 0x679   :  { %3352 = vmatpush3.msra.mxu0 %v4415_v43 }
 0x67a   :  { %3353 = vmatprep.subr.mxu0 %v3718_v0 }
 0x67b   :  { %3354 = vmatpush3.msra.mxu0 %v4421_v44 }
 0x67c   :  { %3355 = vmatprep.subr.mxu0 %v3718_v0 }
 0x67d   :  { %3356 = vmatpush3.msra.mxu0 %v4427_v45 }
 0x67e   :  { %3357 = vmatprep.subr.mxu0 %v3718_v0 }
 0x67f   :  { %v3505_v15 = vpop.eup %3504  ;;  %3358 = vmatpush3.msra.mxu0 %v4433_v46  ;;  %v2001_v46 = vld [vmem:[#allocation11 + $0x78] sm:$0xff] }
 0x680   :  { %3327 = vmatmul.mubr.f32.vlgmr.msra.gmra.mxu1 %v3505_v15  ;;  %3359 = vmatprep.subr.mxu0 %v3718_v0 }
 0x681   :  { %3360 = vmatpush3.msra.mxu0 %v4439_v47  ;;  %3365 = vmatpush3.msra.mxu1 %v4525_v1 }
 0x682   :  { %3362 = vmatmul.mubr.f32.vlgmr.msra.gmra.mxu0 %v3505_v15  ;;  %3366 = vmatprep.subr.mxu1 %v3718_v0 }
 0x683   :  { %3399 = vmatprep.subr.mxu0 %v3718_v0  ;;  %3367 = vmatpush3.msra.mxu1 %v4529_v2  ;;  %v1999_v2 = vld [vmem:[#allocation11 + $0x68] sm:$0xff] }
 0x684   :  { %3400 = vmatpush3.msra.mxu0 %v4447_v48  ;;  %3368 = vmatprep.subr.mxu1 %v3718_v0  ;;  %v2000_v48 = vld [vmem:[#allocation11 + $0x70] sm:$0xff] }
 0x685   :  { %3401 = vmatprep.subr.mxu0 %v3718_v0  ;;  %3369 = vmatpush3.msra.mxu1 %v4535_v19 }
 0x686   :  { %3402 = vmatpush3.msra.mxu0 %v4454_v49  ;;  %3370 = vmatprep.subr.mxu1 %v3718_v0 }
 0x687   :  { %3403 = vmatprep.subr.mxu0 %v3718_v0  ;;  %3371 = vmatpush3.msra.mxu1 %v4541_v21  ;;  %v1998_v21 = vld [vmem:[#allocation11 + $0x60] sm:$0xff] }
 0x688   :  { %3404 = vmatpush3.msra.mxu0 %v4546_v23  ;;  %3372 = vmatprep.subr.mxu1 %v3718_v0  ;;  %v1997_v23 = vld [vmem:[#allocation11 + $0x58] sm:$0xff] }
 0x689   :  { %3405 = vmatprep.subr.mxu0 %v3718_v0  ;;  %3373 = vmatpush3.msra.mxu1 %v4549_v25  ;;  %v1996_v25 = vld [vmem:[#allocation11 + $0x50] sm:$0xff] }
 0x68a   :  { %3406 = vmatpush3.msra.mxu0 %v4554_v29  ;;  %3374 = vmatprep.subr.mxu1 %v3718_v0  ;;  %v1995_v29 = vld [vmem:[#allocation11 + $0x48] sm:$0xff] }
 0x68b   :  { %3407 = vmatprep.subr.mxu0 %v3718_v0  ;;  %3375 = vmatpush3.msra.mxu1 %v4557_v31  ;;  %v1994_v31 = vld [vmem:[#allocation11 + $0x40] sm:$0xff] }
 0x68c   :  { %3408 = vmatpush3.msra.mxu0 %v4562_v32  ;;  %3376 = vmatprep.subr.mxu1 %v3718_v0  ;;  %v1993_v32 = vld [vmem:[#allocation11 + $0x38] sm:$0xff] }
 0x68d   :  { %3409 = vmatprep.subr.mxu0 %v3718_v0  ;;  %3377 = vmatpush3.msra.mxu1 %v4565_v3  ;;  %v1992_v3 = vld [vmem:[#allocation11 + $0x30] sm:$0xff] }
 0x68e   :  { %3410 = vmatpush3.msra.mxu0 %v4570_v5  ;;  %3378 = vmatprep.subr.mxu1 %v3718_v0  ;;  %v1991_v5 = vld [vmem:[#allocation11 + $0x28] sm:$0xff] }
 0x68f   :  { %3411 = vmatprep.subr.mxu0 %v3718_v0  ;;  %3379 = vmatpush3.msra.mxu1 %v4573_v4  ;;  %v1990_v4 = vld [vmem:[#allocation11 + $0x20] sm:$0xff] }
 0x690   :  { %3412 = vmatpush3.msra.mxu0 %v4578_v6  ;;  %3380 = vmatprep.subr.mxu1 %v3718_v0  ;;  %v1989_v6 = vld [vmem:[#allocation11 + $0x18] sm:$0xff] }
 0x691   :  { %3413 = vmatprep.subr.mxu0 %v3718_v0  ;;  %3381 = vmatpush3.msra.mxu1 %v4581_v8  ;;  %v1988_v8 = vld [vmem:[#allocation11 + $0x10] sm:$0xff] }
 0x692   :  { %3414 = vmatpush3.msra.mxu0 %v4586_v10  ;;  %3382 = vmatprep.subr.mxu1 %v3718_v0  ;;  %v1987_v10 = vld [vmem:[#allocation11 + $0x8] sm:$0xff] }
 0x693   :  { %3415 = vmatprep.subr.mxu0 %v3718_v0  ;;  %3383 = vmatpush3.msra.mxu1 %v4589_v12  ;;  %v1986_v12 = vld [vmem:[#allocation11] sm:$0xff] }
 0x694   :  { %3416 = vmatpush3.msra.mxu0 %v4594_v14  ;;  %3384 = vmatprep.subr.mxu1 %v3718_v0 }
 0x695   :  { %3417 = vmatprep.subr.mxu0 %v3718_v0  ;;  %3385 = vmatpush3.msra.mxu1 %v4597_v16 }
 0x696   :  { %3418 = vmatpush3.msra.mxu0 %v4602_v18  ;;  %3386 = vmatprep.subr.mxu1 %v3718_v0 }
 0x697   :  { %3419 = vmatprep.subr.mxu0 %v3718_v0  ;;  %3387 = vmatpush3.msra.mxu1 %v4605_v20 }
 0x698   :  { %3420 = vmatpush3.msra.mxu0 %v4610_v22  ;;  %3388 = vmatprep.subr.mxu1 %v3718_v0 }
 0x699   :  { %3421 = vmatprep.subr.mxu0 %v3718_v0  ;;  %3389 = vmatpush3.msra.mxu1 %v4613_v24 }
 0x69a   :  { %3422 = vmatpush3.msra.mxu0 %v4618_v26  ;;  %3390 = vmatprep.subr.mxu1 %v3718_v0 }
 0x69b   :  { %3423 = vmatprep.subr.mxu0 %v3718_v0  ;;  %3391 = vmatpush3.msra.mxu1 %v4621_v28 }
 0x69c   :  { %3424 = vmatpush3.msra.mxu0 %v4626_v30  ;;  %3392 = vmatprep.subr.mxu1 %v3718_v0 }
 0x69d   :  { %3425 = vmatprep.subr.mxu0 %v3718_v0  ;;  %3393 = vmatpush3.msra.mxu1 %v4629_v33 }
 0x69e   :  { %3426 = vmatpush3.msra.mxu0 %v4634_v36  ;;  %3394 = vmatprep.subr.mxu1 %v3718_v0 }
 0x69f   :  { %3427 = vmatprep.subr.mxu0 %v3718_v0  ;;  %3395 = vmatpush3.msra.mxu1 %v4637_v38 }
 0x6a0   :  { %3396 = vmatprep.mubr.msk.f32.mxu1 %vm3719_vm0, %v3718_v0  ;;  %3428 = vmatpush3.msra.mxu0 %v4643_v9 }
 0x6a1   :  { %3429 = vmatprep.subr.mxu0 %v3718_v0  ;;  %3431 = vmatprep.mubr.msk.f32.mxu0 %vm3719_vm0, %v3718_v0 }
 0x6a2   :  { %3430 = vmatpush3.msra.mxu0 %v4648_v11  ;;  %3434 = vmatprep.subr.mxu1 %v3718_v0 }
 0x722   :  { %v1661_v34 = vpop.f32.mrf.mxu0 }
 0x723   :  { %v1662_v37 = vadd.f32 %v4767_v50, %v1661_v34 }
 0x724   :  { %v3293_v35 = vpop.f32.mrf.mxu0 }
 0x740   :  { %v1731_v39 = vpop.f32.mrf.mxu1 }
 0x741   :  { %v1735_v40 = vadd.f32 %v1731_v39, %v1662_v37 }
 0x742   :  { %v3328_v41 = vpop.f32.mrf.mxu1  ;;  %v1804_v43 = vpop.f32.mrf.mxu0 }
 0x743   :  { %3506 = vtanh.f32 %v1735_v40  ;;  %v1805_v44 = vadd.f32 %v1804_v43, %v1737_v42 }
 0x744   :  { %v3363_v45 = vpop.f32.mrf.mxu0 }
 0x745   :  { %3508 = vtanh.f32 %v1805_v44 }
 0x750   :  { %v3507_v47 = vpop.eup %3506 }
 0x751   :  { %3397 = vmatmul.mubr.f32.vlgmr.msra.gmra.mxu1 %v3507_v47  ;;  %v1967_v49 = vrot.slane %v3507_v47, 2 }
 0x752   :  { %v3509_v1 = vpop.eup %3508  ;;  %3435 = vmatpush3.msra.mxu1 %v2001_v46  ;;  %3466 = vmatprep.mubr.msk.f32.mxu1 %vm3719_vm0, %v3718_v0 }
 0x753   :  { %3432 = vmatmul.mubr.f32.vlgmr.msra.gmra.mxu0 %v3509_v1  ;;  %3436 = vmatprep.subr.mxu1 %v3718_v0  ;;  %v1983_v19 = vsel %vm1982_vm6, %v4775_v59, %v1967_v49 }
 0x754   :  { %3437 = vmatpush3.msra.mxu1 %v2000_v48 }
 0x755   :  { %3438 = vmatprep.subr.mxu1 %v3718_v0 }
 0x756   :  { %3439 = vmatpush3.msra.mxu1 %v1999_v2 }
 0x757   :  { %3440 = vmatprep.subr.mxu1 %v3718_v0 }
 0x758   :  { %3441 = vmatpush3.msra.mxu1 %v1998_v21 }
 0x759   :  { %3442 = vmatprep.subr.mxu1 %v3718_v0 }
 0x75a   :  { %3443 = vmatpush3.msra.mxu1 %v1997_v23 }
 0x75b   :  { %3444 = vmatprep.subr.mxu1 %v3718_v0 }
 0x75c   :  { %3445 = vmatpush3.msra.mxu1 %v1996_v25 }
 0x75d   :  { %3446 = vmatprep.subr.mxu1 %v3718_v0 }
 0x75e   :  { %3447 = vmatpush3.msra.mxu1 %v1995_v29 }
 0x75f   :  { %3448 = vmatprep.subr.mxu1 %v3718_v0 }
 0x760   :  { %3449 = vmatpush3.msra.mxu1 %v1994_v31 }
 0x761   :  { %3450 = vmatprep.subr.mxu1 %v3718_v0 }
 0x762   :  { %3451 = vmatpush3.msra.mxu1 %v1993_v32 }
 0x763   :  { %3452 = vmatprep.subr.mxu1 %v3718_v0 }
 0x764   :  { %3453 = vmatpush3.msra.mxu1 %v1992_v3 }
 0x765   :  { %3454 = vmatprep.subr.mxu1 %v3718_v0 }
 0x766   :  { %3455 = vmatpush3.msra.mxu1 %v1991_v5 }
 0x767   :  { %3456 = vmatprep.subr.mxu1 %v3718_v0 }
 0x768   :  { %3457 = vmatpush3.msra.mxu1 %v1990_v4 }
 0x769   :  { %3458 = vmatprep.subr.mxu1 %v3718_v0 }
 0x76a   :  { %3459 = vmatpush3.msra.mxu1 %v1989_v6 }
 0x76b   :  { %3460 = vmatprep.subr.mxu1 %v3718_v0 }
 0x76c   :  { %3461 = vmatpush3.msra.mxu1 %v1988_v8 }
 0x76d   :  { %3462 = vmatprep.subr.mxu1 %v3718_v0 }
 0x76e   :  { %3463 = vmatpush3.msra.mxu1 %v1987_v10 }
 0x76f   :  { %3464 = vmatprep.subr.mxu1 %v3718_v0 }
 0x770   :  { %3465 = vmatpush3.msra.mxu1 %v1986_v12 }
 0x811   :  { %v1875_v14 = vpop.f32.mrf.mxu1 }
 0x812   :  { %v1876_v16 = vadd.f32 %v4767_v50, %v1875_v14 }
 0x813   :  { %v3398_v18 = vpop.f32.mrf.mxu1  ;;  %v1945_v20 = vpop.f32.mrf.mxu0 }
 0x814   :  { %v1949_v22 = vadd.f32 %v1945_v20, %v1876_v16 }
 0x815   :  { %v3433_v24 = vpop.f32.mrf.mxu0 }
 0x816   :  { %3510 = vtanh.f32 %v1949_v22 }
 0x823   :  { %v3511_v26 = vpop.eup %3510 }
 0x824   :  { %v1970_v28 = vrot.slane %v3511_v26, 1  ;;  %v2080_v30 = vrot.slane %v3511_v26, 7 }
 0x826   :  { %v1985_v33 = vsel %vm1984_vm7, %v1983_v19, %v1970_v28  ;;  %v2082_v36 = vsel %vm1972_vm1, %v3509_v1, %v2080_v30 }
 0x827   :  { %3467 = vmatmul.mubr.f32.vlgmr.msra.gmra.mxu1 %v1985_v33  ;;  %2083 = vst [vmem:[#allocation13] sm:$0x3] %v2082_v36 }
 0x828   :  { %3672 = shalt.err (!%p3669_p1)
}
 0x829   :  { %2103 = dma.vmem_to_hbm [thread:$0]  %s2101_s11, 32, %s4912_s8, [#allocation14]   ;;  %v2116_v0 = vld [vmem:[%s4910_s6] ss:$0 sm:$0xff] }
 0x82a   :  { %s3721_s17 = smov [#allocation12]  }
 0x82b   :  { %s2090_s18 = sshll.u32 %s3721_s17, 4  ;;  %s2091_s18 = int_to_ptr.vmem [resolvable:$true] %s2090_s18 }
 0x82c   :  { %s3681_s1 = scalar_lea.vmem %s2091_s18, 128  ;;  %p3686_p3 = scmp.lt.s32.totalorder %s2091_s18, %s2091_s18 }
 0x82d   :  { %p3682_p2 = scmp.ne.s32.totalorder %s2091_s18, %s3681_s1  ;;  %p3687_p4 = scmp.lt.s32.totalorder %s3681_s1, %s3681_s1 }
 0x82f   :  { %p3688_p5 = por %p3687_p4, %p3686_p3 }
 0x831   :  { %p3689_p6 = pnand %p3688_p5, %p3682_p2 }
 0x8e7   :  { %v2075_v38 = vpop.f32.mrf.mxu1 }
 0x8e8   :  { %v2076_v9 = vadd.f32 %v2116_v0, %v2075_v38 }
 0x8e9   :  { %v3468_v11 = vpop.f32.mrf.mxu1 }
 0x8ea   :  { %2079 = vst [vmem:[#allocation12] sm:$0xff] %v2076_v9 }
 0x8eb   :  { %3692 = shalt.err (!%p3689_p6)
}
 0x8ec   :  { %2093 = dma.vmem_to_hbm [thread:$0]  %s2091_s18, 128, %s4911_s7, [#allocation5]  }
 0x8ed   :  { %3707 = dma.done.wait [#allocation5], 128  }
 0x8ee   :  { %3708 = vsyncadd [#allocation5], 4294967168 }
 0x8ef   :  { %3709 = dma.done.wait [#allocation14], 32  }
 0x8f0   :  { %3710 = vsyncadd [#allocation14], 4294967264 }
 0x8f1   :  { %2110 = vsyncpa [#allocation4], 1 }
 0x8f2   :  { %2111 = vsyncpa [#allocation7], 1 }
 0x8f3   :  { %2112 = vsyncpa [#allocation10], 1 }
 0x8f4   :  { %2113 = vsyncpa [#allocation5], 1 }
 0x8f5   :  { %2114 = vsyncpa [#allocation14], 1 }

</bundles_post_ra>
